<compile_context>
chip_gen: v7x
topology: tpu7x:2x2x1
jax: 0.10.0
libtpu: 0.0.40
codegen_flags: <defaults>
</compile_context>

<pallas_src>
import functools

import jax
import jax.numpy as jnp
from jax.experimental import pallas as pl
from jax.experimental.pallas import tpu as pltpu


def _channel_weights_kernel(x1_ref, x2_ref, w1_ref, b1_ref, w2_ref, b2_ref,
                            out_ref, sum_acc, max1_acc, max2_acc, *, inv_hw):
    """One (batch block, spatial tile) grid step.

    x1_ref, x2_ref : (Bt, C, T)    NCHW features, T = spatial tile (lanes)
    w1_ref         : (2C, hidden)  first Linear weight, (in, out) layout
    b1_ref         : (1, hidden)
    w2_ref         : (hidden, 2C)  second Linear weight, (in, out) layout
    b2_ref         : (1, 2C)
    out_ref        : (Bt, 1, 2C)   sigmoid(MLP(cat(max, avg)))
    sum_acc        : (Bt, C) f32   running sum(x1) + sum(x2) over spatial
    max1_acc       : (Bt, C) f32   running spatial max of x1
    max2_acc       : (Bt, C) f32   running spatial max of x2
    """
    k = pl.program_id(1)

    @pl.when(k == 0)
    def _init():
        sum_acc[...] = jnp.zeros(sum_acc.shape, sum_acc.dtype)
        max1_acc[...] = jnp.full(max1_acc.shape, -jnp.inf, max1_acc.dtype)
        max2_acc[...] = jnp.full(max2_acc.shape, -jnp.inf, max2_acc.dtype)

    # Pool this spatial tile: lane-dense loads, cross-lane (XLU) reductions.
    x1 = x1_ref[...].astype(jnp.float32)                       # (Bt, C, T)
    x2 = x2_ref[...].astype(jnp.float32)
    sum_acc[...] += jnp.sum(x1, axis=-1) + jnp.sum(x2, axis=-1)
    max1_acc[...] = jnp.maximum(max1_acc[...], jnp.max(x1, axis=-1))
    max2_acc[...] = jnp.maximum(max2_acc[...], jnp.max(x2, axis=-1))

    # Finalize: batched MLP over the Bt pooled rows, only on the last tile.
    @pl.when(k == pl.num_programs(1) - 1)
    def _finalize():
        mx = max1_acc[...] + max2_acc[...]                      # (Bt, C)
        avg = sum_acc[...] * inv_hw                             # (Bt, C)
        y = jnp.concatenate([mx, avg], axis=-1)                 # (Bt, 2C)
        h = jnp.dot(y, w1_ref[...], preferred_element_type=jnp.float32)
        h = jnp.maximum(h + b1_ref[...], 0.0)
        o = jnp.dot(h, w2_ref[...], preferred_element_type=jnp.float32)
        out_ref[:, 0, :] = jax.nn.sigmoid(o + b2_ref[...])      # exp/recip -> EUP


def _pick_spatial_tile(hw, c, bt, itemsize, budget_bytes=8 * 1024 * 1024):
    """Largest 128-multiple divisor of hw whose double-buffered x1/x2 blocks fit budget."""
    if hw % 128 != 0:
        return hw                       # small / odd images: full-extent block
    max_elems = budget_bytes // (2 * 2 * bt * c * itemsize)  # 2 inputs x 2 buffers
    tile = min(hw, max(128, (max_elems // 128) * 128))
    while hw % tile:                    # shrink to a divisor (128 always divides)
        tile -= 128
    return tile


def channel_weights_forward(x1, x2, params, *, batch_block=None):
    """ChannelWeights.forward(x1, x2) -> (2, B, dim, 1, 1).

    params = (w1, b1, w2, b2) in PyTorch nn.Linear layout:
      w1: (hidden, 2*dim), b1: (hidden,), w2: (2*dim, hidden), b2: (2*dim,)
    """
    w1, b1, w2, b2 = params
    B, C, H, W = x1.shape
    HW = H * W
    hidden = w1.shape[0]

    # PyTorch (out, in) -> (in, out) for `y @ W`; tiny one-off transposes.
    w1_t = jnp.transpose(w1).astype(jnp.float32)                # (2C, hidden)
    w2_t = jnp.transpose(w2).astype(jnp.float32)                # (hidden, 2C)
    b1_r = b1.reshape(1, hidden).astype(jnp.float32)
    b2_r = b2.reshape(1, 2 * C).astype(jnp.float32)

    # Free view only — no HBM transpose; native dtype passes straight through.
    x1r = x1.reshape(B, C, HW)
    x2r = x2.reshape(B, C, HW)

    # Batch block: keep >= 2 batch blocks when B >= 2 so both v7x TensorCores
    # get work, while batching the MLP over up to 8 rows each for larger B.
    if batch_block is None:
        batch_block = max(1, min(8, B // 2)) if B > 1 else 1
    while B % batch_block:
        batch_block -= 1
    nb = B // batch_block

    tile = _pick_spatial_tile(HW, C, batch_block, x1r.dtype.itemsize)
    kt = HW // tile

    kernel = functools.partial(_channel_weights_kernel, inv_hw=1.0 / float(HW))

    y = pl.pallas_call(
        kernel,
        out_shape=jax.ShapeDtypeStruct((B, 1, 2 * C), jnp.float32),
        grid_spec=pltpu.PrefetchScalarGridSpec(
            num_scalar_prefetch=0,
            grid=(nb, kt),
            in_specs=[
                pl.BlockSpec((batch_block, C, tile), lambda b, k: (b, 0, k)),
                pl.BlockSpec((batch_block, C, tile), lambda b, k: (b, 0, k)),
                pl.BlockSpec((2 * C, hidden), lambda b, k: (0, 0)),
                pl.BlockSpec((1, hidden), lambda b, k: (0, 0)),
                pl.BlockSpec((hidden, 2 * C), lambda b, k: (0, 0)),
                pl.BlockSpec((1, 2 * C), lambda b, k: (0, 0)),
            ],
            out_specs=pl.BlockSpec((batch_block, 1, 2 * C),
                                   lambda b, k: (b, 0, 0)),
            scratch_shapes=[
                pltpu.VMEM((batch_block, C), jnp.float32),   # sum accumulator
                pltpu.VMEM((batch_block, C), jnp.float32),   # max(x1) accumulator
                pltpu.VMEM((batch_block, C), jnp.float32),   # max(x2) accumulator
            ],
        ),
        compiler_params=pltpu.CompilerParams(
            dimension_semantics=("parallel", "arbitrary"),
        ),
    )(x1r, x2r, w1_t, b1_r, w2_t, b2_r)

    y = y.reshape(B, 2 * C)
    # y.view(B, 2*dim, 1).reshape(B, 2, dim, 1, 1).permute(1, 0, 2, 3, 4)
    return y.reshape(B, 2, C, 1, 1).transpose(1, 0, 2, 3, 4)


def channel_weights_ref(x1, x2, params):
    """Pure-JAX reference of the PyTorch module (PyTorch weight layout)."""
    w1, b1, w2, b2 = params
    B, C, _, _ = x1.shape
    avg = jnp.mean(x1, axis=(2, 3)) + jnp.mean(x2, axis=(2, 3))
    mx = jnp.max(x1, axis=(2, 3)) + jnp.max(x2, axis=(2, 3))
    y = jnp.concatenate([mx, avg], axis=1)
    h = jnp.maximum(y @ w1.T + b1, 0.0)
    o = jax.nn.sigmoid(h @ w2.T + b2)
    return o.reshape(B, 2, C, 1, 1).transpose(1, 0, 2, 3, 4)


def init_params(key, dim, reduction=1):
    """Synthetic init in PyTorch nn.Linear (out_features, in_features) layout."""
    hidden = (2 * dim) // reduction
    ks = jax.random.split(key, 4)
    w1 = jax.random.normal(ks[0], (hidden, 2 * dim), jnp.float32) * 0.05
    b1 = jax.random.normal(ks[1], (hidden,), jnp.float32) * 0.01
    w2 = jax.random.normal(ks[2], (2 * dim, hidden), jnp.float32) * 0.05
    b2 = jax.random.normal(ks[3], (2 * dim,), jnp.float32) * 0.01
    return (w1, b1, w2, b2)


if __name__ == "__main__":
    key = jax.random.PRNGKey(0)
    # dim=64 -> 2*dim = 128: the MLP width is exactly one lane group.
    B, C, H, W = 2, 64, 16, 16
    k1, k2, kp = jax.random.split(key, 3)
    x1 = jax.random.normal(k1, (B, C, H, W), jnp.float32)
    x2 = jax.random.normal(k2, (B, C, H, W), jnp.float32)
    params = init_params(kp, C, reduction=1)

    out = jax.jit(channel_weights_forward)(x1, x2, params)
    out = jax.block_until_ready(out)
    assert out.shape == (2, B, C, 1, 1), out.shape

    ref = channel_weights_ref(x1, x2, params)
    err = float(jnp.max(jnp.abs(out - ref)))
    assert err < 1e-4, f"max abs err vs reference: {err}"
    print("KERNEL_OK")
</pallas_src>

<mosaic_0001>
module attributes {stable_mosaic.version = 11 : i64} {
  func.func @_channel_weights_kernel(%arg0: i32, %arg1: i32, %arg2: memref<1x64x256xf32, #tpu.memory_space<vmem>>, %arg3: memref<1x64x256xf32, #tpu.memory_space<vmem>>, %arg4: memref<128x128xf32, #tpu.memory_space<vmem>>, %arg5: memref<1x128xf32, #tpu.memory_space<vmem>>, %arg6: memref<128x128xf32, #tpu.memory_space<vmem>>, %arg7: memref<1x128xf32, #tpu.memory_space<vmem>>, %arg8: memref<1x1x128xf32, #tpu.memory_space<vmem>>, %arg9: memref<1x64xf32, #tpu.memory_space<vmem>>, %arg10: memref<1x64xf32, #tpu.memory_space<vmem>>, %arg11: memref<1x64xf32, #tpu.memory_space<vmem>>) attributes {dimension_semantics = [#tpu.dimension_semantics<parallel>, #tpu.dimension_semantics<arbitrary>], iteration_bounds = array<i64: 2, 1>, scalar_prefetch = 0 : i64, scratch_operands = 3 : i64, tpu.core_type = #tpu.core_type<tc>, window_params = [{transform_indices = @transform_0, window_bounds = array<i64: 1, 64, 256>}, {transform_indices = @transform_1, window_bounds = array<i64: 1, 64, 256>}, {pipeline_mode = #tpu.pipeline_mode<synchronous>, transform_indices = @transform_2, window_bounds = array<i64: 128, 128>}, {pipeline_mode = #tpu.pipeline_mode<synchronous>, transform_indices = @transform_3, window_bounds = array<i64: 1, 128>}, {pipeline_mode = #tpu.pipeline_mode<synchronous>, transform_indices = @transform_4, window_bounds = array<i64: 128, 128>}, {pipeline_mode = #tpu.pipeline_mode<synchronous>, transform_indices = @transform_5, window_bounds = array<i64: 1, 128>}, {transform_indices = @transform_6, window_bounds = array<i64: 1, 1, 128>}]} {
    %c0_i32 = arith.constant 0 : i32
    %0 = arith.cmpi eq, %arg1, %c0_i32 : i32
    %1 = arith.extui %0 : i1 to i32
    %c0_i32_0 = arith.constant 0 : i32
    %2 = arith.cmpi ne, %1, %c0_i32_0 : i32
    scf.if %2 {
      %cst_23 = arith.constant 0.000000e+00 : f32
      %22 = vector.broadcast %cst_23 : f32 to vector<1x64xf32>
      %c0_24 = arith.constant 0 : index
      %c0_25 = arith.constant 0 : index
      %23 = vector.load %arg9[%c0_24, %c0_25] : memref<1x64xf32, #tpu.memory_space<vmem>>, vector<1x64xf32>
      tpu.vector_store %arg9[%c0_24, %c0_25], %22 {strides = array<i32>} : memref<1x64xf32, #tpu.memory_space<vmem>>, vector<1x64xf32>,
      %cst_26 = arith.constant 0xFF800000 : f32
      %24 = vector.broadcast %cst_26 : f32 to vector<1x64xf32>
      %c0_27 = arith.constant 0 : index
      %c0_28 = arith.constant 0 : index
      %25 = vector.load %arg10[%c0_27, %c0_28] : memref<1x64xf32, #tpu.memory_space<vmem>>, vector<1x64xf32>
      tpu.vector_store %arg10[%c0_27, %c0_28], %24 {strides = array<i32>} : memref<1x64xf32, #tpu.memory_space<vmem>>, vector<1x64xf32>,
      %cst_29 = arith.constant 0xFF800000 : f32
      %26 = vector.broadcast %cst_29 : f32 to vector<1x64xf32>
      %c0_30 = arith.constant 0 : index
      %c0_31 = arith.constant 0 : index
      %27 = vector.load %arg11[%c0_30, %c0_31] : memref<1x64xf32, #tpu.memory_space<vmem>>, vector<1x64xf32>
      tpu.vector_store %arg11[%c0_30, %c0_31], %26 {strides = array<i32>} : memref<1x64xf32, #tpu.memory_space<vmem>>, vector<1x64xf32>,
    } else {
    }
    %c0 = arith.constant 0 : index
    %c0_1 = arith.constant 0 : index
    %c0_2 = arith.constant 0 : index
    %3 = vector.load %arg2[%c0, %c0_1, %c0_2] : memref<1x64x256xf32, #tpu.memory_space<vmem>>, vector<1x64x256xf32>
    %c0_3 = arith.constant 0 : index
    %c0_4 = arith.constant 0 : index
    %c0_5 = arith.constant 0 : index
    %4 = vector.load %arg3[%c0_3, %c0_4, %c0_5] : memref<1x64x256xf32, #tpu.memory_space<vmem>>, vector<1x64x256xf32>
    %c0_6 = arith.constant 0 : index
    %c0_7 = arith.constant 0 : index
    %5 = vector.load %arg9[%c0_6, %c0_7] : memref<1x64xf32, #tpu.memory_space<vmem>>, vector<1x64xf32>
    %cst = arith.constant dense<0.000000e+00> : vector<1x64xf32>
    %6 = vector.multi_reduction <add>, %3, %cst [2] : vector<1x64x256xf32> to vector<1x64xf32>
    %cst_8 = arith.constant dense<0.000000e+00> : vector<1x64xf32>
    %7 = vector.multi_reduction <add>, %4, %cst_8 [2] : vector<1x64x256xf32> to vector<1x64xf32>
    %8 = arith.addf %6, %7 : vector<1x64xf32>
    %9 = arith.addf %5, %8 : vector<1x64xf32>
    %c0_9 = arith.constant 0 : index
    %c0_10 = arith.constant 0 : index
    %10 = vector.load %arg9[%c0_9, %c0_10] : memref<1x64xf32, #tpu.memory_space<vmem>>, vector<1x64xf32>
    tpu.vector_store %arg9[%c0_9, %c0_10], %9 {strides = array<i32>} : memref<1x64xf32, #tpu.memory_space<vmem>>, vector<1x64xf32>,
    %c0_11 = arith.constant 0 : index
    %c0_12 = arith.constant 0 : index
    %11 = vector.load %arg10[%c0_11, %c0_12] : memref<1x64xf32, #tpu.memory_space<vmem>>, vector<1x64xf32>
    %cst_13 = arith.constant dense<0xFF800000> : vector<1x64xf32>
    %12 = vector.multi_reduction <maximumf>, %3, %cst_13 [2] : vector<1x64x256xf32> to vector<1x64xf32>
    %13 = arith.maximumf %11, %12 : vector<1x64xf32>
    %c0_14 = arith.constant 0 : index
    %c0_15 = arith.constant 0 : index
    %14 = vector.load %arg10[%c0_14, %c0_15] : memref<1x64xf32, #tpu.memory_space<vmem>>, vector<1x64xf32>
    tpu.vector_store %arg10[%c0_14, %c0_15], %13 {strides = array<i32>} : memref<1x64xf32, #tpu.memory_space<vmem>>, vector<1x64xf32>,
    %c0_16 = arith.constant 0 : index
    %c0_17 = arith.constant 0 : index
    %15 = vector.load %arg11[%c0_16, %c0_17] : memref<1x64xf32, #tpu.memory_space<vmem>>, vector<1x64xf32>
    %cst_18 = arith.constant dense<0xFF800000> : vector<1x64xf32>
    %16 = vector.multi_reduction <maximumf>, %4, %cst_18 [2] : vector<1x64x256xf32> to vector<1x64xf32>
    %17 = arith.maximumf %15, %16 : vector<1x64xf32>
    %c0_19 = arith.constant 0 : index
    %c0_20 = arith.constant 0 : index
    %18 = vector.load %arg11[%c0_19, %c0_20] : memref<1x64xf32, #tpu.memory_space<vmem>>, vector<1x64xf32>
    tpu.vector_store %arg11[%c0_19, %c0_20], %17 {strides = array<i32>} : memref<1x64xf32, #tpu.memory_space<vmem>>, vector<1x64xf32>,
    %c0_i32_21 = arith.constant 0 : i32
    %19 = arith.cmpi eq, %arg1, %c0_i32_21 : i32
    %20 = arith.extui %19 : i1 to i32
    %c0_i32_22 = arith.constant 0 : i32
    %21 = arith.cmpi ne, %20, %c0_i32_22 : i32
    scf.if %21 {
      %c0_23 = arith.constant 0 : index
      %c0_24 = arith.constant 0 : index
      %22 = vector.load %arg10[%c0_23, %c0_24] : memref<1x64xf32, #tpu.memory_space<vmem>>, vector<1x64xf32>
      %c0_25 = arith.constant 0 : index
      %c0_26 = arith.constant 0 : index
      %23 = vector.load %arg11[%c0_25, %c0_26] : memref<1x64xf32, #tpu.memory_space<vmem>>, vector<1x64xf32>
      %24 = arith.addf %22, %23 : vector<1x64xf32>
      %c0_27 = arith.constant 0 : index
      %c0_28 = arith.constant 0 : index
      %25 = vector.load %arg9[%c0_27, %c0_28] : memref<1x64xf32, #tpu.memory_space<vmem>>, vector<1x64xf32>
      %cst_29 = arith.constant 3.906250e-03 : f32
      %26 = vector.broadcast %cst_29 : f32 to vector<1x64xf32>
      %27 = arith.mulf %25, %26 : vector<1x64xf32>
      %28 = tpu.concatenate %24, %27 in 1 : vector<1x64xf32>, vector<1x64xf32> -> vector<1x128xf32>
      %c0_30 = arith.constant 0 : index
      %c0_31 = arith.constant 0 : index
      %29 = vector.load %arg4[%c0_30, %c0_31] : memref<128x128xf32, #tpu.memory_space<vmem>>, vector<128x128xf32>
      %cst_32 = arith.constant dense<0.000000e+00> : vector<1x128xf32>
      %30 = tpu.matmul %28, %29, %cst_32 {dimension_numbers = #tpu.dot_dimension_numbers<[1], [0], [0], [1], [0, 0, 1, 1], [], []>} : vector<1x128xf32>, vector<128x128xf32>, vector<1x128xf32> -> vector<1x128xf32>
      %c0_33 = arith.constant 0 : index
      %c0_34 = arith.constant 0 : index
      %31 = vector.load %arg5[%c0_33, %c0_34] : memref<1x128xf32, #tpu.memory_space<vmem>>, vector<1x128xf32>
      %32 = arith.addf %30, %31 : vector<1x128xf32>
      %cst_35 = arith.constant 0.000000e+00 : f32
      %33 = vector.broadcast %cst_35 : f32 to vector<1x128xf32>
      %34 = arith.maximumf %32, %33 : vector<1x128xf32>
      %c0_36 = arith.constant 0 : index
      %c0_37 = arith.constant 0 : index
      %35 = vector.load %arg6[%c0_36, %c0_37] : memref<128x128xf32, #tpu.memory_space<vmem>>, vector<128x128xf32>
      %cst_38 = arith.constant dense<0.000000e+00> : vector<1x128xf32>
      %36 = tpu.matmul %34, %35, %cst_38 {dimension_numbers = #tpu.dot_dimension_numbers<[1], [0], [0], [1], [0, 0, 1, 1], [], []>} : vector<1x128xf32>, vector<128x128xf32>, vector<1x128xf32> -> vector<1x128xf32>
      %c0_39 = arith.constant 0 : index
      %c0_40 = arith.constant 0 : index
      %37 = vector.load %arg7[%c0_39, %c0_40] : memref<1x128xf32, #tpu.memory_space<vmem>>, vector<1x128xf32>
      %38 = arith.addf %36, %37 : vector<1x128xf32>
      %39 = arith.negf %38 : vector<1x128xf32>
      %40 = math.exp %39 : vector<1x128xf32>
      %cst_41 = arith.constant 1.000000e+00 : f32
      %41 = vector.broadcast %cst_41 : f32 to vector<1x128xf32>
      %42 = arith.addf %41, %40 : vector<1x128xf32>
      %43 = arith.divf %41, %42 : vector<1x128xf32>
      %c0_42 = arith.constant 0 : index
      %c0_43 = arith.constant 0 : index
      %c0_44 = arith.constant 0 : index
      %44 = vector.load %arg8[%c0_42, %c0_43, %c0_44] : memref<1x1x128xf32, #tpu.memory_space<vmem>>, vector<1x1x128xf32>
      %45 = vector.shape_cast %44 : vector<1x1x128xf32> to vector<1x128xf32>
      %46 = vector.shape_cast %43 : vector<1x128xf32> to vector<1x1x128xf32>
      tpu.vector_store %arg8[%c0_42, %c0_43, %c0_44], %46 {strides = array<i32>} : memref<1x1x128xf32, #tpu.memory_space<vmem>>, vector<1x1x128xf32>,
    } else {
    }
    return
  }
  func.func @transform_0(%arg0: i32, %arg1: i32) -> (i32, i32, i32) {
    %c0_i32 = arith.constant 0 : i32
    %c0_i32_0 = arith.constant 0 : i32
    return %arg0, %c0_i32, %arg1 : i32, i32, i32
  }
  func.func @transform_1(%arg0: i32, %arg1: i32) -> (i32, i32, i32) {
    %c0_i32 = arith.constant 0 : i32
    %c0_i32_0 = arith.constant 0 : i32
    return %arg0, %c0_i32, %arg1 : i32, i32, i32
  }
  func.func @transform_2(%arg0: i32, %arg1: i32) -> (i32, i32) {
    %c0_i32 = arith.constant 0 : i32
    %c0_i32_0 = arith.constant 0 : i32
    %c0_i32_1 = arith.constant 0 : i32
    return %c0_i32, %c0_i32_0 : i32, i32
  }
  func.func @transform_3(%arg0: i32, %arg1: i32) -> (i32, i32) {
    %c0_i32 = arith.constant 0 : i32
    %c0_i32_0 = arith.constant 0 : i32
    %c0_i32_1 = arith.constant 0 : i32
    return %c0_i32, %c0_i32_0 : i32, i32
  }
  func.func @transform_4(%arg0: i32, %arg1: i32) -> (i32, i32) {
    %c0_i32 = arith.constant 0 : i32
    %c0_i32_0 = arith.constant 0 : i32
    %c0_i32_1 = arith.constant 0 : i32
    return %c0_i32, %c0_i32_0 : i32, i32
  }
  func.func @transform_5(%arg0: i32, %arg1: i32) -> (i32, i32) {
    %c0_i32 = arith.constant 0 : i32
    %c0_i32_0 = arith.constant 0 : i32
    %c0_i32_1 = arith.constant 0 : i32
    return %c0_i32, %c0_i32_0 : i32, i32
  }
  func.func @transform_6(%arg0: i32, %arg1: i32) -> (i32, i32, i32) {
    %c0_i32 = arith.constant 0 : i32
    %c0_i32_0 = arith.constant 0 : i32
    %c0_i32_1 = arith.constant 0 : i32
    return %arg0, %c0_i32, %c0_i32_0 : i32, i32, i32
  }
}

</mosaic_0001>

<bundles_post_ra>
// kernel: channel_weights_forward.1
= control target key start
LH: loop header
LB: loop body
LE: loop exit
PB: predicated region body
PF: predicated region fallthrough
CT: control target
= control target key end

     0   :  { %s3232_s21 = smov 0   ;;  %s3234_s22 = smov 0   ;;  %s3926_s0 = inlined_call_operand.vmem [shape: f32[2,64,256], index: 0, kind: input, shape index: {}]   ;;  %s3927_s1 = inlined_call_operand.vmem [shape: f32[2,64,256], index: 1, kind: input, shape index: {}]   ;;  %s3928_s2 = inlined_call_operand.vmem [shape: f32[128,128], index: 2, kind: input, shape index: {}]   ;;  %s3929_s3 = inlined_call_operand.vmem [shape: f32[1,128], index: 3, kind: input, shape index: {}]   ;;  %s3930_s4 = inlined_call_operand.vmem [shape: f32[128,128], index: 4, kind: input, shape index: {}]   ;;  %s3931_s5 = inlined_call_operand.vmem [shape: f32[1,128], index: 5, kind: input, shape index: {}]   ;;  %s3932_s6 = inlined_call_operand.vmem [shape: f32[2,1,128], index: 6, kind: output, shape index: {}]  }
   0x1   :  { %s3236_s23 = smov 0  }
   0x2 LB: > { %s28_s24 = sadd.s32 1, %s3184_s22  ;;  %p2967_p0 = scmp.ge.s32.totalorder %s3188_s23, 1  ;;  %s3188_s23 = sphi %s3236_s23, %s16_s23   ;;  %s3184_s22 = sphi %s3234_s22, %s3934_s22   ;;  %s3180_s21 = sphi %s3232_s21, %s3933_s21  }
   0x3   : > { %p30_p1 = scmp.ge.s32.totalorder %s28_s24, 2  ;;  %p248_p2 = scmp.lt.s32.totalorder %s3188_s23, 3 }
   0x5   : > { %s3936_s24 = smov (%p30_p1, %s28_s24), 0  ;;  %p249_p3 = pnand %p2967_p0, %p248_p2 }
   0x6   : > { %p290_p4 = scmp.lt.s32.totalorder (!%p249_p3), %s3180_s21, 1  ;;  %v3190_v49 = vmov (!%p249_p3), 0   ;;  %vm316_vm0 = vcmask (!%p249_p3), 516096   ;;  %vm1100_vm1 = vcmask (!%p249_p3), 130112   ;;  %vm1107_vm2 = vcmask (!%p249_p3), 195712   ;;  %s3196_s16 = smov (!%p249_p3), 64  }
   0x7   : > { %252 = sbr.rel (%p249_p3) target bundleno = 939 (0x3ab), region = 44  ;;  %3160 = vset.pattern.permute.xlu0 (!%p249_p3), %v3190_v49  ;;  %3161 = vset.pattern.permute.xlu1 (!%p249_p3), %v3190_v49  ;;  %vm1114_vm3 = vcmask (!%p249_p3), 261312   ;;  %vm1121_vm4 = vcmask (!%p249_p3), 326912   ;;  %vm1128_vm5 = vcmask (!%p249_p3), 392512   ;;  %vm1135_vm6 = vcmask (!%p249_p3), 458112  }
   0x8   : > { %vm1142_vm7 = vcmask (!%p249_p3), 523712   ;;  %vm3195_vm8 = vmmov (!%p249_p3), 0   ;;  %vm2700_vm9 = vcmask (!%p249_p3), 523264  }
   0xe   : > { %s3938_s21 = smov (!%p290_p4, %s3180_s21), 1 }
   0xf   : > { %s2975_s25 = sshll.u32 %s3938_s21, 7  ;;  %s311_s19 = scalar_lea.vmem %s3932_s6, %s3938_s21 }
  0x10   : > { %s3256_s28 = scalar_lea.vmem %s3927_s1, %s2975_s25  ;;  %s3261_s7 = scalar_lea.vmem %s3926_s0, %s2975_s25 }
  0x11   : > { %v3264_v0 = vld [vmem:[%s3256_s28] sm:$0xff]  ;;  %v3267_v1 = vld [vmem:[%s3256_s28 + $0x8] sm:$0xff]  ;;  %v3278_v5 = vld [vmem:[%s3256_s28 + $0x10] sm:$0xff] }
  0x12   : > { %v3270_v2 = vld [vmem:[%s3261_s7] sm:$0xff]  ;;  %v377_v3 = vadd.f32 %v3267_v1, %v3264_v0  ;;  %v3275_v4 = vld [vmem:[%s3261_s7 + $0x8] sm:$0xff]  ;;  %v3281_v6 = vld [vmem:[%s3256_s28 + $0x18] sm:$0xff]  ;;  %v1924_v52 = vmax.f32 %v3264_v0, %v3267_v1  ;;  %v417_v1 = vlaneseq }
  0x13   : > { %v353_v7 = vadd.f32 %v3275_v4, %v3270_v2  ;;  %v322_v8 = vld [vmem:[%s3261_s7 + $0x10] sm:$0xff]  ;;  %v323_v9 = vld [vmem:[%s3261_s7 + $0x18] sm:$0xff]  ;;  %v380_v10 = vadd.f32 %v3281_v6, %v3278_v5  ;;  %v3290_v12 = vld [vmem:[%s3256_s28 + $0x20] sm:$0xff]  ;;  %v1163_v50 = vmax.f32 %v3270_v2, %v3275_v4  ;;  %v1927_v51 = vmax.f32 %v3278_v5, %v3281_v6 }
  0x14   : > { %378 = vadd.xlane.f32.xlu1 %v377_v3  ;;  %v356_v11 = vadd.f32 %v323_v9, %v322_v8  ;;  %v341_v13 = vld [vmem:[%s3256_s28 + $0x28] sm:$0xff]  ;;  %v3294_v14 = vld [vmem:[%s3261_s7 + $0x20] sm:$0xff]  ;;  %v342_v18 = vld [vmem:[%s3256_s28 + $0x30] sm:$0xff]  ;;  %v1166_v48 = vmax.f32 %v322_v8, %v323_v9  ;;  %v3191_v2 = vmov 1966171168   ;;  %v3328_v4 = vshrl.u32 %v417_v1, 7 }
  0x15   : > { %354 = vadd.xlane.f32.xlu0 %v353_v7  ;;  %v325_v15 = vld [vmem:[%s3261_s7 + $0x28] sm:$0xff]  ;;  %v383_v16 = vadd.f32 %v341_v13, %v3290_v12  ;;  %v343_v19 = vld [vmem:[%s3256_s28 + $0x38] sm:$0xff]  ;;  %v326_v20 = vld [vmem:[%s3261_s7 + $0x30] sm:$0xff]  ;;  %v1930_v53 = vmax.f32 %v3290_v12, %v341_v13  ;;  %v678_v3 = vunpack.c.l.s4 %v3191_v2 }
  0x16   : > { %v359_v17 = vadd.f32 %v325_v15, %v3294_v14  ;;  %v327_v21 = vld [vmem:[%s3261_s7 + $0x38] sm:$0xff]  ;;  %v386_v22 = vadd.f32 %v343_v19, %v342_v18  ;;  %v344_v24 = vld [vmem:[%s3256_s28 + $0x40] sm:$0xff]  ;;  %v345_v25 = vld [vmem:[%s3256_s28 + $0x48] sm:$0xff]  ;;  %v1169_v54 = vmax.f32 %v3294_v14, %v325_v15  ;;  %v1933_v55 = vmax.f32 %v342_v18, %v343_v19 }
  0x17   : > { %v362_v23 = vadd.f32 %v327_v21, %v326_v20  ;;  %v328_v26 = vld [vmem:[%s3261_s7 + $0x40] sm:$0xff]  ;;  %v329_v27 = vld [vmem:[%s3261_s7 + $0x48] sm:$0xff]  ;;  %v389_v28 = vadd.f32 %v345_v25, %v344_v24  ;;  %v346_v30 = vld [vmem:[%s3256_s28 + $0x50] sm:$0xff]  ;;  %v1172_v56 = vmax.f32 %v326_v20, %v327_v21  ;;  %v1936_v57 = vmax.f32 %v344_v24, %v345_v25 }
  0x18   : > { %381 = vadd.xlane.f32.xlu1 %v380_v10  ;;  %v365_v29 = vadd.f32 %v329_v27, %v328_v26  ;;  %v347_v31 = vld [vmem:[%s3256_s28 + $0x58] sm:$0xff]  ;;  %v330_v32 = vld [vmem:[%s3261_s7 + $0x50] sm:$0xff]  ;;  %v348_v36 = vld [vmem:[%s3256_s28 + $0x60] sm:$0xff]  ;;  %v1175_v58 = vmax.f32 %v328_v26, %v329_v27  ;;  %v679_v5 = vunpack.c.0.s8 %v678_v3  ;;  %v3331_v7 = vsub.s32 0, %v3328_v4 }
  0x19   : > { %357 = vadd.xlane.f32.xlu0 %v356_v11  ;;  %v331_v33 = vld [vmem:[%s3261_s7 + $0x58] sm:$0xff]  ;;  %v392_v34 = vadd.f32 %v347_v31, %v346_v30  ;;  %v349_v37 = vld [vmem:[%s3256_s28 + $0x68] sm:$0xff]  ;;  %v332_v38 = vld [vmem:[%s3261_s7 + $0x60] sm:$0xff]  ;;  %v1939_v59 = vmax.f32 %v346_v30, %v347_v31  ;;  %v3334_v8 = vsub.s32 1, %v3328_v4  ;;  %v3337_v9 = vsub.s32 2, %v3328_v4 }
  0x1a   : > { %v368_v35 = vadd.f32 %v331_v33, %v330_v32  ;;  %v333_v39 = vld [vmem:[%s3261_s7 + $0x68] sm:$0xff]  ;;  %v395_v40 = vadd.f32 %v349_v37, %v348_v36  ;;  %v350_v42 = vld [vmem:[%s3256_s28 + $0x70] sm:$0xff]  ;;  %v351_v43 = vld [vmem:[%s3256_s28 + $0x78] sm:$0xff]  ;;  %v1178_v60 = vmax.f32 %v330_v32, %v331_v33  ;;  %v1942_v61 = vmax.f32 %v348_v36, %v349_v37 }
  0x1b   : > { %v371_v41 = vadd.f32 %v333_v39, %v332_v38  ;;  %v334_v44 = vld [vmem:[%s3261_s7 + $0x70] sm:$0xff]  ;;  %v335_v45 = vld [vmem:[%s3261_s7 + $0x78] sm:$0xff]  ;;  %v398_v46 = vadd.f32 %v351_v43, %v350_v42  ;;  %v1181_v62 = vmax.f32 %v332_v38, %v333_v39  ;;  %v1945_v63 = vmax.f32 %v350_v42, %v351_v43 }
  0x1c   : > { %384 = vadd.xlane.f32.xlu1 %v383_v16  ;;  %v374_v47 = vadd.f32 %v335_v45, %v334_v44  ;;  %v1184_v0 = vmax.f32 %v334_v44, %v335_v45  ;;  %v3340_v10 = vsub.s32 3, %v3328_v4  ;;  %v3343_v12 = vsub.s32 4, %v3328_v4 }
  0x1d   : > { %360 = vadd.xlane.f32.xlu0 %v359_v17  ;;  %v3346_v13 = vsub.s32 5, %v3328_v4  ;;  %v3349_v14 = vsub.s32 6, %v3328_v4  ;;  %v3352_v15 = vsub.s32 7, %v3328_v4  ;;  %v3355_v17 = vsub.s32 %v679_v5, %v3328_v4 }
  0x20   : > { %387 = vadd.xlane.f32.xlu1 %v386_v22 }
  0x21   : > { %363 = vadd.xlane.f32.xlu0 %v362_v23 }
  0x24   : > { %390 = vadd.xlane.f32.xlu1 %v389_v28 }
  0x25   : > { %366 = vadd.xlane.f32.xlu0 %v365_v29 }
  0x28   : > { %393 = vadd.xlane.f32.xlu1 %v392_v34 }
  0x29   : > { %369 = vadd.xlane.f32.xlu0 %v368_v35 }
  0x2c   : > { %396 = vadd.xlane.f32.xlu1 %v395_v40 }
  0x2d   : > { %372 = vadd.xlane.f32.xlu0 %v371_v41 }
  0x30   : > { %399 = vadd.xlane.f32.xlu1 %v398_v46 }
  0x31   : > { %375 = vadd.xlane.f32.xlu0 %v374_v47 }
  0x34   : > { %1167 = vmax.xlane.f32.xlu1 %v1166_v48 }
  0x35   : > { %1164 = vmax.xlane.f32.xlu0 %v1163_v50 }
  0x38   : > { %1928 = vmax.xlane.f32.xlu1 %v1927_v51 }
  0x39   : > { %1925 = vmax.xlane.f32.xlu0 %v1924_v52 }
  0x3c   : > { %1931 = vmax.xlane.f32.xlu1 %v1930_v53 }
  0x3d   : > { %1170 = vmax.xlane.f32.xlu0 %v1169_v54 }
  0x40   : > { %1934 = vmax.xlane.f32.xlu1 %v1933_v55 }
  0x41   : > { %1173 = vmax.xlane.f32.xlu0 %v1172_v56 }
  0x44   : > { %1937 = vmax.xlane.f32.xlu1 %v1936_v57 }
  0x45   : > { %1176 = vmax.xlane.f32.xlu0 %v1175_v58 }
  0x48   : > { %1940 = vmax.xlane.f32.xlu1 %v1939_v59 }
  0x49   : > { %1179 = vmax.xlane.f32.xlu0 %v1178_v60 }
  0x4c   : > { %1943 = vmax.xlane.f32.xlu1 %v1942_v61 }
  0x4d   : > { %1182 = vmax.xlane.f32.xlu0 %v1181_v62 }
  0x50   : > { %1946 = vmax.xlane.f32.xlu1 %v1945_v63 }
  0x51   : > { %1185 = vmax.xlane.f32.xlu0 %v1184_v0 }
  0xa1   : > { %v379_v6 = vpop.xlane.xlu1 %378 }
  0xa2   : > { %v355_v11 = vpop.xlane.xlu0 %354 }
  0xa3   : > { %v401_v16 = vadd.f32 %v379_v6, %v355_v11 }
  0xa5   : > { %v382_v18 = vpop.xlane.xlu1 %381  ;;  %v420_v19 = vrot.slane %v401_v16, %v3331_v7  ;;  %v424_v20 = vrot.slane %v401_v16, %v3334_v8  ;;  %v428_v21 = vrot.slane %v401_v16, %v3337_v9  ;;  %v432_v22 = vrot.slane %v401_v16, %v3340_v10 }
  0xa6   : > { %v358_v23 = vpop.xlane.xlu0 %357  ;;  %v436_v24 = vrot.slane %v401_v16, %v3343_v12  ;;  %v440_v25 = vrot.slane %v401_v16, %v3346_v13  ;;  %v444_v26 = vrot.slane %v401_v16, %v3349_v14  ;;  %v448_v27 = vrot.slane %v401_v16, %v3352_v15 }
  0xa7   : > { %v402_v28 = vadd.f32 %v382_v18, %v358_v23  ;;  %v673_v29 = vcombine.low %v420_v19, %v424_v20  ;;  %v674_v30 = vcombine.low %v428_v21, %v432_v22 }
  0xa8   : > { %v675_v31 = vcombine.low %v436_v24, %v440_v25  ;;  %v676_v32 = vcombine.low %v444_v26, %v448_v27 }
  0xa9   : > { %v385_v33 = vpop.xlane.xlu1 %384  ;;  %v683_v34 = vrot.slane %v673_v29, %v3355_v17  ;;  %v690_v35 = vrot.slane %v674_v30, %v3355_v17  ;;  %v452_v36 = vrot.slane %v402_v28, %v3331_v7  ;;  %v456_v37 = vrot.slane %v402_v28, %v3334_v8 }
  0xaa   : > { %v361_v38 = vpop.xlane.xlu0 %360  ;;  %v697_v39 = vrot.slane %v675_v31, %v3355_v17  ;;  %v704_v40 = vrot.slane %v676_v32, %v3355_v17  ;;  %v460_v41 = vrot.slane %v402_v28, %v3337_v9  ;;  %v464_v42 = vrot.slane %v402_v28, %v3340_v10 }
  0xab   : > { %v403_v43 = vadd.f32 %v385_v33, %v361_v38  ;;  %v705_v44 = vcombine.low %v683_v34, %v690_v35  ;;  %v468_v45 = vrot.slane %v402_v28, %v3343_v12  ;;  %v472_v46 = vrot.slane %v402_v28, %v3346_v13 }
  0xac   : > { %v706_v47 = vcombine.low %v697_v39, %v704_v40  ;;  %v476_v48 = vrot.slane %v402_v28, %v3349_v14  ;;  %v480_v49 = vrot.slane %v402_v28, %v3352_v15  ;;  %v722_v50 = vcombine.low %v452_v36, %v456_v37 }
  0xad   : > { %v388_v51 = vpop.xlane.xlu1 %387  ;;  %v713_v52 = vrot.slane %v705_v44, %v3355_v17  ;;  %v723_v53 = vcombine.low %v460_v41, %v464_v42  ;;  %v724_v54 = vcombine.low %v468_v45, %v472_v46  ;;  %v484_v55 = vrot.slane %v403_v43, %v3331_v7 }
  0xae   : > { %v364_v56 = vpop.xlane.xlu0 %363  ;;  %v720_v57 = vrot.slane %v706_v47, %v3355_v17  ;;  %v725_v58 = vcombine.low %v476_v48, %v480_v49  ;;  %v732_v59 = vrot.slane %v722_v50, %v3355_v17  ;;  %v488_v60 = vrot.slane %v403_v43, %v3334_v8 }
  0xaf   : > { %v404_v61 = vadd.f32 %v388_v51, %v364_v56  ;;  %v739_v62 = vrot.slane %v723_v53, %v3355_v17  ;;  %v746_v63 = vrot.slane %v724_v54, %v3355_v17  ;;  %v492_v0 = vrot.slane %v403_v43, %v3337_v9 }
  0xb0   : > { %v721_v2 = vcombine.low %v713_v52, %v720_v57  ;;  %v753_v3 = vrot.slane %v725_v58, %v3355_v17  ;;  %v496_v5 = vrot.slane %v403_v43, %v3340_v10  ;;  %v500_v6 = vrot.slane %v403_v43, %v3343_v12 }
  0xb1   : > { %v391_v11 = vpop.xlane.xlu1 %390  ;;  %v754_v16 = vcombine.low %v732_v59, %v739_v62  ;;  %v504_v18 = vrot.slane %v403_v43, %v3346_v13  ;;  %v508_v19 = vrot.slane %v403_v43, %v3349_v14  ;;  %v512_v20 = vrot.slane %v403_v43, %v3352_v15 }
  0xb2   : > { %1066 = vperm.xlu0 %3160, %v721_v2   ;;  %v367_v21 = vpop.xlane.xlu0 %366  ;;  %v755_v22 = vcombine.low %v746_v63, %v753_v3  ;;  %v771_v23 = vcombine.low %v484_v55, %v488_v60  ;;  %v772_v24 = vcombine.low %v492_v0, %v496_v5  ;;  %v516_v25 = vrot.slane %v404_v61, %v3331_v7 }
  0xb3   : > { %v405_v26 = vadd.f32 %v391_v11, %v367_v21  ;;  %v762_v27 = vrot.slane %v754_v16, %v3355_v17  ;;  %v773_v28 = vcombine.low %v500_v6, %v504_v18  ;;  %v774_v29 = vcombine.low %v508_v19, %v512_v20 }
  0xb4   : > { %v769_v30 = vrot.slane %v755_v22, %v3355_v17  ;;  %v781_v31 = vrot.slane %v771_v23, %v3355_v17  ;;  %v788_v32 = vrot.slane %v772_v24, %v3355_v17  ;;  %v520_v33 = vrot.slane %v404_v61, %v3334_v8 }
  0xb5   : > { %v394_v34 = vpop.xlane.xlu1 %393  ;;  %v795_v35 = vrot.slane %v773_v28, %v3355_v17  ;;  %v802_v36 = vrot.slane %v774_v29, %v3355_v17  ;;  %v524_v37 = vrot.slane %v404_v61, %v3337_v9  ;;  %v528_v38 = vrot.slane %v404_v61, %v3340_v10 }
  0xb6   : > { %v770_v39 = vcombine.low %v762_v27, %v769_v30  ;;  %v370_v40 = vpop.xlane.xlu0 %369  ;;  %v803_v41 = vcombine.low %v781_v31, %v788_v32  ;;  %v532_v42 = vrot.slane %v404_v61, %v3343_v12  ;;  %v536_v43 = vrot.slane %v404_v61, %v3346_v13 }
  0xb7   : > { %v406_v44 = vadd.f32 %v394_v34, %v370_v40  ;;  %v804_v45 = vcombine.low %v795_v35, %v802_v36  ;;  %v540_v46 = vrot.slane %v404_v61, %v3349_v14  ;;  %v544_v47 = vrot.slane %v404_v61, %v3352_v15 }
  0xb8   : > { %1069 = vperm.xlu1 %3161, %v770_v39   ;;  %v811_v48 = vrot.slane %v803_v41, %v3355_v17  ;;  %v820_v49 = vcombine.low %v516_v25, %v520_v33  ;;  %v821_v50 = vcombine.low %v524_v37, %v528_v38  ;;  %v822_v51 = vcombine.low %v532_v42, %v536_v43 }
  0xb9   : > { %v818_v52 = vrot.slane %v804_v45, %v3355_v17  ;;  %v397_v53 = vpop.xlane.xlu1 %396  ;;  %v823_v54 = vcombine.low %v540_v46, %v544_v47  ;;  %v548_v55 = vrot.slane %v405_v26, %v3331_v7  ;;  %v552_v56 = vrot.slane %v405_v26, %v3334_v8 }
  0xba   : > { %v373_v57 = vpop.xlane.xlu0 %372  ;;  %v830_v58 = vrot.slane %v820_v49, %v3355_v17  ;;  %v837_v59 = vrot.slane %v821_v50, %v3355_v17  ;;  %v844_v60 = vrot.slane %v822_v51, %v3355_v17  ;;  %v556_v61 = vrot.slane %v405_v26, %v3337_v9 }
  0xbb   : > { %v819_v62 = vcombine.low %v811_v48, %v818_v52  ;;  %v407_v63 = vadd.f32 %v397_v53, %v373_v57  ;;  %v851_v0 = vrot.slane %v823_v54, %v3355_v17  ;;  %v560_v2 = vrot.slane %v405_v26, %v3340_v10 }
  0xbc   : > { %v852_v3 = vcombine.low %v830_v58, %v837_v59  ;;  %v564_v5 = vrot.slane %v405_v26, %v3343_v12  ;;  %v568_v6 = vrot.slane %v405_v26, %v3346_v13  ;;  %v572_v11 = vrot.slane %v405_v26, %v3349_v14 }
  0xbd   : > { %1072 = vperm.xlu1 %3161, %v819_v62   ;;  %v853_v16 = vcombine.low %v844_v60, %v851_v0  ;;  %v400_v18 = vpop.xlane.xlu1 %399  ;;  %v576_v19 = vrot.slane %v405_v26, %v3352_v15  ;;  %v869_v20 = vcombine.low %v548_v55, %v552_v56  ;;  %v870_v21 = vcombine.low %v556_v61, %v560_v2 }
  0xbe   : > { %v860_v22 = vrot.slane %v852_v3, %v3355_v17  ;;  %v376_v23 = vpop.xlane.xlu0 %375  ;;  %v871_v24 = vcombine.low %v564_v5, %v568_v6  ;;  %v580_v25 = vrot.slane %v406_v44, %v3331_v7  ;;  %v584_v27 = vrot.slane %v406_v44, %v3334_v8 }
  0xbf   : > { %v867_v28 = vrot.slane %v853_v16, %v3355_v17  ;;  %v3423_v29 = vadd.f32 %v400_v18, %v376_v23  ;;  %v872_v30 = vcombine.low %v572_v11, %v576_v19  ;;  %v879_v31 = vrot.slane %v869_v20, %v3355_v17 }
  0xc0   : > { %v886_v32 = vrot.slane %v870_v21, %v3355_v17  ;;  %v893_v26 = vrot.slane %v871_v24, %v3355_v17  ;;  %v588_v33 = vrot.slane %v406_v44, %v3337_v9  ;;  %v592_v34 = vrot.slane %v406_v44, %v3340_v10 }
  0xc1   : > { %v868_v35 = vcombine.low %v860_v22, %v867_v28  ;;  %v900_v36 = vrot.slane %v872_v30, %v3355_v17  ;;  %v596_v37 = vrot.slane %v406_v44, %v3343_v12  ;;  %v600_v38 = vrot.slane %v406_v44, %v3346_v13  ;;  %v1168_v22 = vpop.xlane.xlu1 %1167 }
  0xc2   : > { %v901_v39 = vcombine.low %v879_v31, %v886_v32  ;;  %v604_v40 = vrot.slane %v406_v44, %v3349_v14  ;;  %v608_v41 = vrot.slane %v406_v44, %v3352_v15  ;;  %v918_v42 = vcombine.low %v580_v25, %v584_v27 }
  0xc3   : > { %1075 = vperm.xlu1 %3161, %v868_v35   ;;  %v902_v43 = vcombine.low %v893_v26, %v900_v36  ;;  %v919_v45 = vcombine.low %v588_v33, %v592_v34  ;;  %v920_v46 = vcombine.low %v596_v37, %v600_v38  ;;  %v612_v47 = vrot.slane %v407_v63, %v3331_v7 }
  0xc4   : > { %v909_v48 = vrot.slane %v901_v39, %v3355_v17  ;;  %v921_v49 = vcombine.low %v604_v40, %v608_v41  ;;  %v928_v50 = vrot.slane %v918_v42, %v3355_v17  ;;  %v616_v51 = vrot.slane %v407_v63, %v3334_v8 }
  0xc5   : > { %v916_v52 = vrot.slane %v902_v43, %v3355_v17  ;;  %v935_v53 = vrot.slane %v919_v45, %v3355_v17  ;;  %v942_v44 = vrot.slane %v920_v46, %v3355_v17  ;;  %v620_v54 = vrot.slane %v407_v63, %v3337_v9  ;;  %v1165_v45 = vpop.xlane.xlu0 %1164 }
  0xc6   : > { %v949_v55 = vrot.slane %v921_v49, %v3355_v17  ;;  %v624_v56 = vrot.slane %v407_v63, %v3340_v10  ;;  %v628_v57 = vrot.slane %v407_v63, %v3343_v12  ;;  %v632_v58 = vrot.slane %v407_v63, %v3346_v13 }
  0xc7   : > { %v917_v59 = vcombine.low %v909_v48, %v916_v52  ;;  %v950_v60 = vcombine.low %v928_v50, %v935_v53  ;;  %v636_v61 = vrot.slane %v407_v63, %v3349_v14  ;;  %v640_v62 = vrot.slane %v407_v63, %v3352_v15 }
  0xc8   : > { %v951_v0 = vcombine.low %v942_v44, %v949_v55  ;;  %v967_v2 = vcombine.low %v612_v47, %v616_v51  ;;  %v968_v3 = vcombine.low %v620_v54, %v624_v56  ;;  %v969_v5 = vcombine.low %v628_v57, %v632_v58 }
  0xc9   : > { %1078 = vperm.xlu1 %3161, %v917_v59   ;;  %v958_v6 = vrot.slane %v950_v60, %v3355_v17  ;;  %v970_v11 = vcombine.low %v636_v61, %v640_v62  ;;  %v644_v16 = vrot.slane %v3423_v29, %v3331_v7  ;;  %v648_v18 = vrot.slane %v3423_v29, %v3334_v8 }
  0xca   : > { %v965_v19 = vrot.slane %v951_v0, %v3355_v17  ;;  %v977_v20 = vrot.slane %v967_v2, %v3355_v17  ;;  %v984_v63 = vrot.slane %v968_v3, %v3355_v17  ;;  %v991_v21 = vrot.slane %v969_v5, %v3355_v17 }
  0xcb   : > { %v998_v23 = vrot.slane %v970_v11, %v3355_v17  ;;  %v652_v24 = vrot.slane %v3423_v29, %v3337_v9  ;;  %v656_v25 = vrot.slane %v3423_v29, %v3340_v10  ;;  %v660_v27 = vrot.slane %v3423_v29, %v3343_v12  ;;  %v1929_v11 = vpop.xlane.xlu1 %1928 }
  0xcc   : > { %v966_v28 = vcombine.low %v958_v6, %v965_v19  ;;  %v999_v30 = vcombine.low %v977_v20, %v984_v63  ;;  %v664_v31 = vrot.slane %v3423_v29, %v3346_v13  ;;  %v668_v32 = vrot.slane %v3423_v29, %v3349_v14 }
  0xcd   : > { %v1000_v26 = vcombine.low %v991_v21, %v998_v23  ;;  %v672_v33 = vrot.slane %v3423_v29, %v3352_v15  ;;  %v1016_v34 = vcombine.low %v644_v16, %v648_v18  ;;  %v1017_v35 = vcombine.low %v652_v24, %v656_v25 }
  0xce   : > { %1081 = vperm.xlu1 %3161, %v966_v28   ;;  %v1007_v36 = vrot.slane %v999_v30, %v3355_v17  ;;  %v1018_v37 = vcombine.low %v660_v27, %v664_v31  ;;  %v1230_v38 = vrot.slane %v1168_v22, %v3331_v7  ;;  %v1234_v39 = vrot.slane %v1168_v22, %v3334_v8 }
  0xcf   : > { %v1014_v40 = vrot.slane %v1000_v26, %v3355_v17  ;;  %v1019_v41 = vcombine.low %v668_v32, %v672_v33  ;;  %v1026_v42 = vrot.slane %v1016_v34, %v3355_v17  ;;  %v1033_v43 = vrot.slane %v1017_v35, %v3355_v17 }
  0xd0   : > { %v1040_v29 = vrot.slane %v1018_v37, %v3355_v17  ;;  %v1238_v46 = vrot.slane %v1168_v22, %v3337_v9  ;;  %v1242_v47 = vrot.slane %v1168_v22, %v3340_v10  ;;  %v1246_v48 = vrot.slane %v1168_v22, %v3343_v12  ;;  %v1926_v37 = vpop.xlane.xlu0 %1925 }
  0xd1   : > { %v1015_v49 = vcombine.low %v1007_v36, %v1014_v40  ;;  %v1047_v50 = vrot.slane %v1019_v41, %v3355_v17  ;;  %v1048_v51 = vcombine.low %v1026_v42, %v1033_v43  ;;  %v1250_v52 = vrot.slane %v1168_v22, %v3346_v13 }
  0xd2   : > { %v1254_v53 = vrot.slane %v1168_v22, %v3349_v14  ;;  %v1258_v44 = vrot.slane %v1168_v22, %v3352_v15  ;;  %v1500_v54 = vcombine.low %v1230_v38, %v1234_v39  ;;  %v1501_v55 = vcombine.low %v1238_v46, %v1242_v47 }
  0xd3   : > { %1084 = vperm.xlu1 %3161, %v1015_v49   ;;  %v1049_v56 = vcombine.low %v1040_v29, %v1047_v50  ;;  %v1056_v57 = vrot.slane %v1048_v51, %v3355_v17  ;;  %v1502_v58 = vcombine.low %v1246_v48, %v1250_v52  ;;  %v1198_v59 = vrot.slane %v1165_v45, %v3331_v7 }
  0xd4   : > { %v1503_v60 = vcombine.low %v1254_v53, %v1258_v44  ;;  %v1510_v61 = vrot.slane %v1500_v54, %v3355_v17  ;;  %v1517_v62 = vrot.slane %v1501_v55, %v3355_v17  ;;  %v1202_v0 = vrot.slane %v1165_v45, %v3334_v8 }
  0xd5   : > { %v1063_v2 = vrot.slane %v1049_v56, %v3355_v17  ;;  %v1524_v3 = vrot.slane %v1502_v58, %v3355_v17  ;;  %v1206_v5 = vrot.slane %v1165_v45, %v3337_v9  ;;  %v1210_v6 = vrot.slane %v1165_v45, %v3340_v10 }
  0xd6   : > { %v1531_v16 = vrot.slane %v1503_v60, %v3355_v17  ;;  %v1532_v18 = vcombine.low %v1510_v61, %v1517_v62  ;;  %v1214_v19 = vrot.slane %v1165_v45, %v3343_v12  ;;  %v1218_v20 = vrot.slane %v1165_v45, %v3346_v13 }
  0xd7   : > { %v1064_v63 = vcombine.low %v1056_v57, %v1063_v2  ;;  %v1222_v21 = vrot.slane %v1165_v45, %v3349_v14  ;;  %v1226_v22 = vrot.slane %v1165_v45, %v3352_v15  ;;  %v1451_v23 = vcombine.low %v1198_v59, %v1202_v0  ;;  %v1932_v57 = vpop.xlane.xlu1 %1931 }
  0xd8   : > { %v1533_v24 = vcombine.low %v1524_v3, %v1531_v16  ;;  %v1540_v25 = vrot.slane %v1532_v18, %v3355_v17  ;;  %v1452_v27 = vcombine.low %v1206_v5, %v1210_v6  ;;  %v1453_v28 = vcombine.low %v1214_v19, %v1218_v20 }
  0xd9   : > { %1087 = vperm.xlu1 %3161, %v1064_v63   ;;  %v1454_v30 = vcombine.low %v1222_v21, %v1226_v22  ;;  %v1461_v31 = vrot.slane %v1451_v23, %v3355_v17  ;;  %v1991_v32 = vrot.slane %v1929_v11, %v3331_v7  ;;  %v1995_v26 = vrot.slane %v1929_v11, %v3334_v8 }
  0xda   : > { %v1547_v33 = vrot.slane %v1533_v24, %v3355_v17  ;;  %v1468_v34 = vrot.slane %v1452_v27, %v3355_v17  ;;  %v1475_v35 = vrot.slane %v1453_v28, %v3355_v17  ;;  %v1999_v36 = vrot.slane %v1929_v11, %v3337_v9 }
  0xdb   : > { %v1482_v38 = vrot.slane %v1454_v30, %v3355_v17  ;;  %v2003_v39 = vrot.slane %v1929_v11, %v3340_v10  ;;  %v2007_v40 = vrot.slane %v1929_v11, %v3343_v12  ;;  %v2011_v41 = vrot.slane %v1929_v11, %v3346_v13 }
  0xdc   : > { %v1548_v42 = vcombine.low %v1540_v25, %v1547_v33  ;;  %v1483_v43 = vcombine.low %v1461_v31, %v1468_v34  ;;  %v2015_v45 = vrot.slane %v1929_v11, %v3349_v14  ;;  %v2019_v29 = vrot.slane %v1929_v11, %v3352_v15  ;;  %v1171_v25 = vpop.xlane.xlu0 %1170 }
  0xdd   : > { %v1484_v46 = vcombine.low %v1475_v35, %v1482_v38  ;;  %v2261_v47 = vcombine.low %v1991_v32, %v1995_v26  ;;  %v2262_v48 = vcombine.low %v1999_v36, %v2003_v39  ;;  %v2263_v49 = vcombine.low %v2007_v40, %v2011_v41 }
  0xde   : > { %1847 = vperm.xlu0 %3160, %v1548_v42   ;;  %v1491_v50 = vrot.slane %v1483_v43, %v3355_v17  ;;  %v2264_v51 = vcombine.low %v2015_v45, %v2019_v29  ;;  %v1959_v52 = vrot.slane %v1926_v37, %v3331_v7  ;;  %v1963_v53 = vrot.slane %v1926_v37, %v3334_v8 }
  0xdf   : > { %v1498_v44 = vrot.slane %v1484_v46, %v3355_v17  ;;  %v2271_v54 = vrot.slane %v2261_v47, %v3355_v17  ;;  %v2278_v55 = vrot.slane %v2262_v48, %v3355_v17  ;;  %v2285_v56 = vrot.slane %v2263_v49, %v3355_v17 }
  0xe0   : > { %v2292_v58 = vrot.slane %v2264_v51, %v3355_v17  ;;  %v1967_v59 = vrot.slane %v1926_v37, %v3337_v9  ;;  %v1971_v60 = vrot.slane %v1926_v37, %v3340_v10  ;;  %v1975_v61 = vrot.slane %v1926_v37, %v3343_v12  ;;  %v1935_v51 = vpop.xlane.xlu1 %1934 }
  0xe1   : > { %v1499_v62 = vcombine.low %v1491_v50, %v1498_v44  ;;  %v2293_v0 = vcombine.low %v2271_v54, %v2278_v55  ;;  %v1979_v2 = vrot.slane %v1926_v37, %v3346_v13  ;;  %v1983_v3 = vrot.slane %v1926_v37, %v3349_v14 }
  0xe2   : > { %v2294_v5 = vcombine.low %v2285_v56, %v2292_v58  ;;  %v1987_v6 = vrot.slane %v1926_v37, %v3352_v15  ;;  %v2212_v11 = vcombine.low %v1959_v52, %v1963_v53  ;;  %v2213_v16 = vcombine.low %v1967_v59, %v1971_v60 }
  0xe3   : > { %1844 = vperm.xlu1 %3161, %v1499_v62   ;;  %v2301_v18 = vrot.slane %v2293_v0, %v3355_v17  ;;  %v2214_v19 = vcombine.low %v1975_v61, %v1979_v2  ;;  %v2023_v20 = vrot.slane %v1932_v57, %v3331_v7  ;;  %v2027_v63 = vrot.slane %v1932_v57, %v3334_v8 }
  0xe4   : > { %v2308_v21 = vrot.slane %v2294_v5, %v3355_v17  ;;  %v2215_v22 = vcombine.low %v1983_v3, %v1987_v6  ;;  %v2222_v23 = vrot.slane %v2212_v11, %v3355_v17  ;;  %v2229_v24 = vrot.slane %v2213_v16, %v3355_v17 }
  0xe5   : > { %v2236_v27 = vrot.slane %v2214_v19, %v3355_v17  ;;  %v2031_v28 = vrot.slane %v1932_v57, %v3337_v9  ;;  %v2035_v30 = vrot.slane %v1932_v57, %v3340_v10  ;;  %v2039_v31 = vrot.slane %v1932_v57, %v3343_v12  ;;  %v1174_v19 = vpop.xlane.xlu0 %1173 }
  0xe6   : > { %v2309_v32 = vcombine.low %v2301_v18, %v2308_v21  ;;  %v2243_v26 = vrot.slane %v2215_v22, %v3355_v17  ;;  %v2244_v33 = vcombine.low %v2222_v23, %v2229_v24  ;;  %v2043_v34 = vrot.slane %v1932_v57, %v3346_v13 }
  0xe7   : > { %v2047_v35 = vrot.slane %v1932_v57, %v3349_v14  ;;  %v2051_v36 = vrot.slane %v1932_v57, %v3352_v15  ;;  %v2310_v37 = vcombine.low %v2023_v20, %v2027_v63  ;;  %v2311_v38 = vcombine.low %v2031_v28, %v2035_v30 }
  0xe8   : > { %2608 = vperm.xlu0 %3160, %v2309_v32   ;;  %v2245_v39 = vcombine.low %v2236_v27, %v2243_v26  ;;  %v2252_v40 = vrot.slane %v2244_v33, %v3355_v17  ;;  %v2312_v41 = vcombine.low %v2039_v31, %v2043_v34  ;;  %v1262_v42 = vrot.slane %v1171_v25, %v3331_v7 }
  0xe9   : > { %v2313_v43 = vcombine.low %v2047_v35, %v2051_v36  ;;  %v2320_v45 = vrot.slane %v2310_v37, %v3355_v17  ;;  %v2327_v29 = vrot.slane %v2311_v38, %v3355_v17  ;;  %v1266_v46 = vrot.slane %v1171_v25, %v3334_v8 }
  0xea   : > { %v2259_v47 = vrot.slane %v2245_v39, %v3355_v17  ;;  %v2334_v48 = vrot.slane %v2312_v41, %v3355_v17  ;;  %v1270_v49 = vrot.slane %v1171_v25, %v3337_v9  ;;  %v1274_v50 = vrot.slane %v1171_v25, %v3340_v10 }
  0xeb   : > { %v2341_v52 = vrot.slane %v2313_v43, %v3355_v17  ;;  %v2342_v53 = vcombine.low %v2320_v45, %v2327_v29  ;;  %v1278_v44 = vrot.slane %v1171_v25, %v3343_v12  ;;  %v1282_v54 = vrot.slane %v1171_v25, %v3346_v13 }
  0xec   : > { %v2260_v55 = vcombine.low %v2252_v40, %v2259_v47  ;;  %v1286_v56 = vrot.slane %v1171_v25, %v3349_v14  ;;  %v1290_v57 = vrot.slane %v1171_v25, %v3352_v15  ;;  %v1549_v58 = vcombine.low %v1262_v42, %v1266_v46  ;;  %v1938_v40 = vpop.xlane.xlu1 %1937 }
  0xed   : > { %v2343_v59 = vcombine.low %v2334_v48, %v2341_v52  ;;  %v2350_v60 = vrot.slane %v2342_v53, %v3355_v17  ;;  %v1550_v61 = vcombine.low %v1270_v49, %v1274_v50  ;;  %v1551_v62 = vcombine.low %v1278_v44, %v1282_v54 }
  0xee   : > { %2605 = vperm.xlu1 %3161, %v2260_v55   ;;  %v1552_v0 = vcombine.low %v1286_v56, %v1290_v57  ;;  %v1559_v2 = vrot.slane %v1549_v58, %v3355_v17  ;;  %v2055_v3 = vrot.slane %v1935_v51, %v3331_v7  ;;  %v2059_v5 = vrot.slane %v1935_v51, %v3334_v8 }
  0xef   : > { %v2357_v6 = vrot.slane %v2343_v59, %v3355_v17  ;;  %v1566_v11 = vrot.slane %v1550_v61, %v3355_v17  ;;  %v1573_v16 = vrot.slane %v1551_v62, %v3355_v17  ;;  %v2063_v18 = vrot.slane %v1935_v51, %v3337_v9 }
  0xf0   : > { %v1580_v20 = vrot.slane %v1552_v0, %v3355_v17  ;;  %v2067_v63 = vrot.slane %v1935_v51, %v3340_v10  ;;  %v2071_v21 = vrot.slane %v1935_v51, %v3343_v12  ;;  %v2075_v22 = vrot.slane %v1935_v51, %v3346_v13 }
  0xf1   : > { %v2358_v23 = vcombine.low %v2350_v60, %v2357_v6  ;;  %v1581_v24 = vcombine.low %v1559_v2, %v1566_v11  ;;  %v2079_v25 = vrot.slane %v1935_v51, %v3349_v14  ;;  %v2083_v27 = vrot.slane %v1935_v51, %v3352_v15  ;;  %v1177_v60 = vpop.xlane.xlu0 %1176 }
  0xf2   : > { %v1582_v28 = vcombine.low %v1573_v16, %v1580_v20  ;;  %v2359_v30 = vcombine.low %v2055_v3, %v2059_v5  ;;  %v2360_v31 = vcombine.low %v2063_v18, %v2067_v63  ;;  %v2361_v32 = vcombine.low %v2071_v21, %v2075_v22 }
  0xf3   : > { %2611 = vperm.xlu0 %3160, %v2358_v23   ;;  %v1589_v26 = vrot.slane %v1581_v24, %v3355_v17  ;;  %v2362_v33 = vcombine.low %v2079_v25, %v2083_v27  ;;  %v1294_v34 = vrot.slane %v1174_v19, %v3331_v7  ;;  %v1298_v35 = vrot.slane %v1174_v19, %v3334_v8 }
  0xf4   : > { %v1596_v36 = vrot.slane %v1582_v28, %v3355_v17  ;;  %v2369_v37 = vrot.slane %v2359_v30, %v3355_v17  ;;  %v2376_v38 = vrot.slane %v2360_v31, %v3355_v17  ;;  %v2383_v39 = vrot.slane %v2361_v32, %v3355_v17 }
  0xf5   : > { %v2390_v41 = vrot.slane %v2362_v33, %v3355_v17  ;;  %v1302_v42 = vrot.slane %v1174_v19, %v3337_v9  ;;  %v1306_v43 = vrot.slane %v1174_v19, %v3340_v10  ;;  %v1310_v45 = vrot.slane %v1174_v19, %v3343_v12  ;;  %v1941_v33 = vpop.xlane.xlu1 %1940 }
  0xf6   : > { %v1597_v29 = vcombine.low %v1589_v26, %v1596_v36  ;;  %v2391_v46 = vcombine.low %v2369_v37, %v2376_v38  ;;  %v1314_v47 = vrot.slane %v1174_v19, %v3346_v13  ;;  %v1318_v48 = vrot.slane %v1174_v19, %v3349_v14 }
  0xf7   : > { %v2392_v49 = vcombine.low %v2383_v39, %v2390_v41  ;;  %v1322_v50 = vrot.slane %v1174_v19, %v3352_v15  ;;  %v1598_v51 = vcombine.low %v1294_v34, %v1298_v35  ;;  %v1599_v52 = vcombine.low %v1302_v42, %v1306_v43 }
  0xf8   : > { %1850 = vperm.xlu1 %3161, %v1597_v29   ;;  %v2399_v53 = vrot.slane %v2391_v46, %v3355_v17  ;;  %v1600_v44 = vcombine.low %v1310_v45, %v1314_v47  ;;  %v2087_v54 = vrot.slane %v1938_v40, %v3331_v7  ;;  %v2091_v55 = vrot.slane %v1938_v40, %v3334_v8 }
  0xf9   : > { %v2406_v56 = vrot.slane %v2392_v49, %v3355_v17  ;;  %v1601_v57 = vcombine.low %v1318_v48, %v1322_v50  ;;  %v1608_v58 = vrot.slane %v1598_v51, %v3355_v17  ;;  %v1615_v59 = vrot.slane %v1599_v52, %v3355_v17 }
  0xfa   : > { %v1622_v61 = vrot.slane %v1600_v44, %v3355_v17  ;;  %v2095_v62 = vrot.slane %v1938_v40, %v3337_v9  ;;  %v2099_v0 = vrot.slane %v1938_v40, %v3340_v10  ;;  %v2103_v2 = vrot.slane %v1938_v40, %v3343_v12  ;;  %v1180_v44 = vpop.xlane.xlu0 %1179 }
  0xfb   : > { %v2407_v3 = vcombine.low %v2399_v53, %v2406_v56  ;;  %v1629_v5 = vrot.slane %v1601_v57, %v3355_v17  ;;  %v1630_v6 = vcombine.low %v1608_v58, %v1615_v59  ;;  %v2107_v11 = vrot.slane %v1938_v40, %v3346_v13 }
  0xfc   : > { %v2111_v16 = vrot.slane %v1938_v40, %v3349_v14  ;;  %v2115_v18 = vrot.slane %v1938_v40, %v3352_v15  ;;  %v2408_v19 = vcombine.low %v2087_v54, %v2091_v55  ;;  %v2409_v20 = vcombine.low %v2095_v62, %v2099_v0 }
  0xfd   : > { %2614 = vperm.xlu0 %3160, %v2407_v3   ;;  %v1631_v63 = vcombine.low %v1622_v61, %v1629_v5  ;;  %v1638_v21 = vrot.slane %v1630_v6, %v3355_v17  ;;  %v2410_v22 = vcombine.low %v2103_v2, %v2107_v11  ;;  %v1326_v23 = vrot.slane %v1177_v60, %v3331_v7 }
  0xfe   : > { %v2411_v24 = vcombine.low %v2111_v16, %v2115_v18  ;;  %v2418_v25 = vrot.slane %v2408_v19, %v3355_v17  ;;  %v2425_v27 = vrot.slane %v2409_v20, %v3355_v17  ;;  %v1330_v28 = vrot.slane %v1177_v60, %v3334_v8 }
  0xff   : > { %v1645_v30 = vrot.slane %v1631_v63, %v3355_v17  ;;  %v2432_v31 = vrot.slane %v2410_v22, %v3355_v17  ;;  %v1334_v32 = vrot.slane %v1177_v60, %v3337_v9  ;;  %v1338_v26 = vrot.slane %v1177_v60, %v3340_v10 }
 0x100   : > { %v2439_v34 = vrot.slane %v2411_v24, %v3355_v17  ;;  %v2440_v35 = vcombine.low %v2418_v25, %v2425_v27  ;;  %v1342_v36 = vrot.slane %v1177_v60, %v3343_v12  ;;  %v1346_v37 = vrot.slane %v1177_v60, %v3346_v13 }
 0x101   : > { %v1646_v38 = vcombine.low %v1638_v21, %v1645_v30  ;;  %v1350_v39 = vrot.slane %v1177_v60, %v3349_v14  ;;  %v1354_v40 = vrot.slane %v1177_v60, %v3352_v15  ;;  %v1647_v41 = vcombine.low %v1326_v23, %v1330_v28  ;;  %v1944_v21 = vpop.xlane.xlu1 %1943 }
 0x102   : > { %v2441_v42 = vcombine.low %v2432_v31, %v2439_v34  ;;  %v2448_v43 = vrot.slane %v2440_v35, %v3355_v17  ;;  %v1648_v45 = vcombine.low %v1334_v32, %v1338_v26  ;;  %v1649_v29 = vcombine.low %v1342_v36, %v1346_v37 }
 0x103   : > { %1853 = vperm.xlu1 %3161, %v1646_v38   ;;  %v1650_v46 = vcombine.low %v1350_v39, %v1354_v40  ;;  %v1657_v47 = vrot.slane %v1647_v41, %v3355_v17  ;;  %v2119_v48 = vrot.slane %v1941_v33, %v3331_v7  ;;  %v2123_v49 = vrot.slane %v1941_v33, %v3334_v8 }
 0x104   : > { %v2455_v50 = vrot.slane %v2441_v42, %v3355_v17  ;;  %v1664_v51 = vrot.slane %v1648_v45, %v3355_v17  ;;  %v1671_v52 = vrot.slane %v1649_v29, %v3355_v17  ;;  %v2127_v53 = vrot.slane %v1941_v33, %v3337_v9 }
 0x105   : > { %v1678_v54 = vrot.slane %v1650_v46, %v3355_v17  ;;  %v2131_v55 = vrot.slane %v1941_v33, %v3340_v10  ;;  %v2135_v56 = vrot.slane %v1941_v33, %v3343_v12  ;;  %v2139_v57 = vrot.slane %v1941_v33, %v3346_v13 }
 0x106   : > { %v2456_v58 = vcombine.low %v2448_v43, %v2455_v50  ;;  %v1679_v59 = vcombine.low %v1657_v47, %v1664_v51  ;;  %v2143_v60 = vrot.slane %v1941_v33, %v3349_v14  ;;  %v2147_v61 = vrot.slane %v1941_v33, %v3352_v15  ;;  %v1183_v43 = vpop.xlane.xlu0 %1182 }
 0x107   : > { %v1680_v62 = vcombine.low %v1671_v52, %v1678_v54  ;;  %v2457_v0 = vcombine.low %v2119_v48, %v2123_v49  ;;  %v2458_v2 = vcombine.low %v2127_v53, %v2131_v55  ;;  %v2459_v3 = vcombine.low %v2135_v56, %v2139_v57 }
 0x108   : > { %2617 = vperm.xlu0 %3160, %v2456_v58   ;;  %v1687_v5 = vrot.slane %v1679_v59, %v3355_v17  ;;  %v2460_v6 = vcombine.low %v2143_v60, %v2147_v61  ;;  %v1358_v11 = vrot.slane %v1180_v44, %v3331_v7  ;;  %v1362_v16 = vrot.slane %v1180_v44, %v3334_v8 }
 0x109   : > { %v1694_v18 = vrot.slane %v1680_v62, %v3355_v17  ;;  %v2467_v19 = vrot.slane %v2457_v0, %v3355_v17  ;;  %v2474_v20 = vrot.slane %v2458_v2, %v3355_v17  ;;  %v2481_v63 = vrot.slane %v2459_v3, %v3355_v17 }
 0x10a   : > { %v2488_v22 = vrot.slane %v2460_v6, %v3355_v17  ;;  %v1366_v23 = vrot.slane %v1180_v44, %v3337_v9  ;;  %v1370_v24 = vrot.slane %v1180_v44, %v3340_v10  ;;  %v1374_v25 = vrot.slane %v1180_v44, %v3343_v12  ;;  %v1947_v6 = vpop.xlane.xlu1 %1946 }
 0x10b   : > { %v1695_v27 = vcombine.low %v1687_v5, %v1694_v18  ;;  %v2489_v28 = vcombine.low %v2467_v19, %v2474_v20  ;;  %v1378_v30 = vrot.slane %v1180_v44, %v3346_v13  ;;  %v1382_v31 = vrot.slane %v1180_v44, %v3349_v14 }
 0x10c   : > { %v2490_v32 = vcombine.low %v2481_v63, %v2488_v22  ;;  %v1386_v26 = vrot.slane %v1180_v44, %v3352_v15  ;;  %v1696_v33 = vcombine.low %v1358_v11, %v1362_v16  ;;  %v1697_v34 = vcombine.low %v1366_v23, %v1370_v24 }
 0x10d   : > { %1856 = vperm.xlu1 %3161, %v1695_v27   ;;  %v2497_v35 = vrot.slane %v2489_v28, %v3355_v17  ;;  %v1698_v36 = vcombine.low %v1374_v25, %v1378_v30  ;;  %v2151_v37 = vrot.slane %v1944_v21, %v3331_v7  ;;  %v2155_v38 = vrot.slane %v1944_v21, %v3334_v8 }
 0x10e   : > { %v2504_v39 = vrot.slane %v2490_v32, %v3355_v17  ;;  %v1699_v40 = vcombine.low %v1382_v31, %v1386_v26  ;;  %v1706_v41 = vrot.slane %v1696_v33, %v3355_v17  ;;  %v1713_v42 = vrot.slane %v1697_v34, %v3355_v17 }
 0x10f   : > { %v1720_v45 = vrot.slane %v1698_v36, %v3355_v17  ;;  %v2159_v29 = vrot.slane %v1944_v21, %v3337_v9  ;;  %v2163_v46 = vrot.slane %v1944_v21, %v3340_v10  ;;  %v2167_v47 = vrot.slane %v1944_v21, %v3343_v12  ;;  %v1186_v36 = vpop.xlane.xlu0 %1185 }
 0x110   : > { %v2505_v48 = vcombine.low %v2497_v35, %v2504_v39  ;;  %v1727_v49 = vrot.slane %v1699_v40, %v3355_v17  ;;  %v1728_v50 = vcombine.low %v1706_v41, %v1713_v42  ;;  %v2171_v51 = vrot.slane %v1944_v21, %v3346_v13 }
 0x111   : > { %v2175_v52 = vrot.slane %v1944_v21, %v3349_v14  ;;  %v2179_v53 = vrot.slane %v1944_v21, %v3352_v15  ;;  %v2506_v44 = vcombine.low %v2151_v37, %v2155_v38  ;;  %v2507_v54 = vcombine.low %v2159_v29, %v2163_v46 }
 0x112   : > { %2620 = vperm.xlu0 %3160, %v2505_v48   ;;  %v1729_v55 = vcombine.low %v1720_v45, %v1727_v49  ;;  %v1736_v56 = vrot.slane %v1728_v50, %v3355_v17  ;;  %v2508_v57 = vcombine.low %v2167_v47, %v2171_v51  ;;  %v1390_v58 = vrot.slane %v1183_v43, %v3331_v7 }
 0x113   : > { %v2509_v59 = vcombine.low %v2175_v52, %v2179_v53  ;;  %v2516_v60 = vrot.slane %v2506_v44, %v3355_v17  ;;  %v2523_v61 = vrot.slane %v2507_v54, %v3355_v17  ;;  %v1394_v62 = vrot.slane %v1183_v43, %v3334_v8 }
 0x114   : > { %v1743_v0 = vrot.slane %v1729_v55, %v3355_v17  ;;  %v2530_v2 = vrot.slane %v2508_v57, %v3355_v17  ;;  %v1398_v3 = vrot.slane %v1183_v43, %v3337_v9  ;;  %v1402_v5 = vrot.slane %v1183_v43, %v3340_v10 }
 0x115   : > { %v2537_v11 = vrot.slane %v2509_v59, %v3355_v17  ;;  %v2538_v16 = vcombine.low %v2516_v60, %v2523_v61  ;;  %v1406_v18 = vrot.slane %v1183_v43, %v3343_v12  ;;  %v1410_v19 = vrot.slane %v1183_v43, %v3346_v13 }
 0x116   : > { %v1744_v20 = vcombine.low %v1736_v56, %v1743_v0  ;;  %v1414_v63 = vrot.slane %v1183_v43, %v3349_v14  ;;  %v1418_v21 = vrot.slane %v1183_v43, %v3352_v15  ;;  %v1745_v22 = vcombine.low %v1390_v58, %v1394_v62 }
 0x117   : > { %v2539_v23 = vcombine.low %v2530_v2, %v2537_v11  ;;  %v2546_v24 = vrot.slane %v2538_v16, %v3355_v17  ;;  %v1746_v25 = vcombine.low %v1398_v3, %v1402_v5  ;;  %v1747_v27 = vcombine.low %v1406_v18, %v1410_v19 }
 0x118   : > { %1859 = vperm.xlu1 %3161, %v1744_v20   ;;  %v1748_v28 = vcombine.low %v1414_v63, %v1418_v21  ;;  %v1755_v30 = vrot.slane %v1745_v22, %v3355_v17  ;;  %v2183_v31 = vrot.slane %v1947_v6, %v3331_v7  ;;  %v2187_v32 = vrot.slane %v1947_v6, %v3334_v8 }
 0x119   : > { %v2553_v26 = vrot.slane %v2539_v23, %v3355_v17  ;;  %v1762_v33 = vrot.slane %v1746_v25, %v3355_v17  ;;  %v1769_v34 = vrot.slane %v1747_v27, %v3355_v17  ;;  %v2191_v35 = vrot.slane %v1947_v6, %v3337_v9  ;;  %v2703_v25 = vld [vmem:[%s3928_s2 + $0x8] sm:$0xff]  ;;  %v2704_v27 = vld [vmem:[%s3928_s2 + $0x10] sm:$0xff] }
 0x11a   : > { %v1776_v37 = vrot.slane %v1748_v28, %v3355_v17  ;;  %v2195_v38 = vrot.slane %v1947_v6, %v3340_v10  ;;  %v2199_v39 = vrot.slane %v1947_v6, %v3343_v12  ;;  %v2203_v40 = vrot.slane %v1947_v6, %v3346_v13 }
 0x11b   : > { %v2554_v41 = vcombine.low %v2546_v24, %v2553_v26  ;;  %v1777_v42 = vcombine.low %v1755_v30, %v1762_v33  ;;  %v2207_v43 = vrot.slane %v1947_v6, %v3349_v14  ;;  %v2211_v45 = vrot.slane %v1947_v6, %v3352_v15  ;;  %v2702_v24 = vld [vmem:[%s3928_s2] sm:$0xff] }
 0x11c   : > { %v1778_v29 = vcombine.low %v1769_v34, %v1776_v37  ;;  %v2555_v46 = vcombine.low %v2183_v31, %v2187_v32  ;;  %v2556_v47 = vcombine.low %v2191_v35, %v2195_v38  ;;  %v2557_v48 = vcombine.low %v2199_v39, %v2203_v40  ;;  %v2705_v32 = vld [vmem:[%s3928_s2 + $0x18] sm:$0xff]  ;;  %v2706_v33 = vld [vmem:[%s3928_s2 + $0x20] sm:$0xff]  ;;  %v2707_v34 = vld [vmem:[%s3928_s2 + $0x28] sm:$0xff] }
 0x11d   : > { %2623 = vperm.xlu0 %3160, %v2554_v41   ;;  %v1785_v49 = vrot.slane %v1777_v42, %v3355_v17  ;;  %v2558_v50 = vcombine.low %v2207_v43, %v2211_v45  ;;  %v1422_v51 = vrot.slane %v1186_v36, %v3331_v7  ;;  %v1426_v52 = vrot.slane %v1186_v36, %v3334_v8  ;;  %v2708_v37 = vld [vmem:[%s3928_s2 + $0x30] sm:$0xff]  ;;  %v2709_v38 = vld [vmem:[%s3928_s2 + $0x38] sm:$0xff]  ;;  %v2710_v41 = vld [vmem:[%s3928_s2 + $0x40] sm:$0xff] }
 0x11e   : > { %v1792_v53 = vrot.slane %v1778_v29, %v3355_v17  ;;  %v2565_v44 = vrot.slane %v2555_v46, %v3355_v17  ;;  %v2572_v54 = vrot.slane %v2556_v47, %v3355_v17  ;;  %v2579_v55 = vrot.slane %v2557_v48, %v3355_v17  ;;  %v2711_v42 = vld [vmem:[%s3928_s2 + $0x48] sm:$0xff]  ;;  %v2712_v45 = vld [vmem:[%s3928_s2 + $0x50] sm:$0xff]  ;;  %v2713_v29 = vld [vmem:[%s3928_s2 + $0x58] sm:$0xff] }
 0x11f   : > { %v2586_v56 = vrot.slane %v2558_v50, %v3355_v17  ;;  %v1430_v57 = vrot.slane %v1186_v36, %v3337_v9  ;;  %v1434_v58 = vrot.slane %v1186_v36, %v3340_v10  ;;  %v1438_v59 = vrot.slane %v1186_v36, %v3343_v12 }
 0x120   : > { %v1793_v60 = vcombine.low %v1785_v49, %v1792_v53  ;;  %v2587_v61 = vcombine.low %v2565_v44, %v2572_v54  ;;  %v1442_v8 = vrot.slane %v1186_v36, %v3346_v13  ;;  %v1446_v62 = vrot.slane %v1186_v36, %v3349_v14 }
 0x121   : > { %v2588_v0 = vcombine.low %v2579_v55, %v2586_v56  ;;  %v1450_v2 = vrot.slane %v1186_v36, %v3352_v15  ;;  %v1794_v3 = vcombine.low %v1422_v51, %v1426_v52  ;;  %v1795_v5 = vcombine.low %v1430_v57, %v1434_v58  ;;  %v2714_v51 = vld [vmem:[%s3928_s2 + $0x60] sm:$0xff]  ;;  %v2715_v52 = vld [vmem:[%s3928_s2 + $0x68] sm:$0xff] }
 0x122   : > { %1862 = vperm.xlu1 %3161, %v1793_v60   ;;  %v2595_v6 = vrot.slane %v2587_v61, %v3355_v17  ;;  %v1796_v11 = vcombine.low %v1438_v59, %v1442_v8  ;;  %v3192_v22 = vmov 0.0   ;;  %v3193_v23 = vmov -inf   ;;  %v2716_v59 = vld [vmem:[%s3928_s2 + $0x70] sm:$0xff]  ;;  %v2717_v60 = vld [vmem:[%s3928_s2 + $0x78] sm:$0xff] }
 0x123   : > { %v2602_v9 = vrot.slane %v2588_v0, %v3355_v17  ;;  %v1797_v10 = vcombine.low %v1446_v62, %v1450_v2  ;;  %v1804_v12 = vrot.slane %v1794_v3, %v3355_v17  ;;  %v1811_v16 = vrot.slane %v1795_v5, %v3355_v17  ;;  %317 = vst.msk [vmem:[#allocation2] sm:$0x1] %vm316_vm0, %v3192_v22 }
 0x124   : > { %v1818_v13 = vrot.slane %v1796_v11, %v3355_v17  ;;  %319 = vst.msk [vmem:[#allocation4] sm:$0x1] %vm316_vm0, %v3193_v23  ;;  %318 = vst.msk [vmem:[#allocation3] sm:$0x1] %vm316_vm0, %v3193_v23  ;;  %v3194_v30 = vmov 0.0|0.0   ;;  %v3082_v31 = vpack.c.bf16 %v2703_v25, %v2702_v24  ;;  %v3085_v26 = vpack.c.bf16 %v2705_v32, %v2704_v27  ;;  %3043 = vmatprep.mubr.msk.f32.mxu0 %vm3195_vm8, %v3192_v22 }
 0x125   : > { %v2603_v18 = vcombine.low %v2595_v6, %v2602_v9  ;;  %v1825_v14 = vrot.slane %v1797_v10, %v3355_v17  ;;  %v1826_v19 = vcombine.low %v1804_v12, %v1811_v16  ;;  %3081 = vmatprep.subr.bf16.mxu0 %v3194_v30  ;;  %3105 = vmatprep.subr.bf16.mxu1 %v3194_v30  ;;  %v1090_v46 = vand.u32 127, %v417_v1 }
 0x126   : > { %3083 = vmatpush3.bf16.msra.mxu0 %v3082_v31  ;;  %v3088_v36 = vpack.c.bf16 %v2707_v34, %v2706_v33  ;;  %v3091_v39 = vpack.c.bf16 %v2709_v38, %v2708_v37  ;;  %v3094_v43 = vpack.c.bf16 %v2711_v42, %v2710_v41  ;;  %v3097_v49 = vpack.c.bf16 %v2713_v29, %v2712_v45  ;;  %v2792_v37 = vld [vmem:[%s3930_s4 + $0x10] sm:$0xff]  ;;  %v2795_v45 = vld [vmem:[%s3930_s4 + $0x28] sm:$0xff] }
 0x127   : > { %2626 = vperm.xlu0 %3160, %v2603_v18   ;;  %v1827_v15 = vcombine.low %v1818_v13, %v1825_v14  ;;  %v1834_v20 = vrot.slane %v1826_v19, %v3355_v17  ;;  %3084 = vmatprep.subr.bf16.mxu0 %v3194_v30  ;;  %v1095_v48 = vadd.s32 4294967288, %v1090_v46  ;;  %v1102_v50 = vadd.s32 4294967280, %v1090_v46 }
 0x128   : > { %v1109_v53 = vadd.s32 4294967272, %v1090_v46  ;;  %v1116_v44 = vadd.s32 4294967264, %v1090_v46  ;;  %v1123_v1 = vadd.s32 4294967256, %v1090_v46  ;;  %v3100_v56 = vpack.c.bf16 %v2715_v52, %v2714_v51  ;;  %3078 = vmatprep.mubr.msk.f32.mxu1 %vm3195_vm8, %v3192_v22 }
 0x129   : > { %v1841_v63 = vrot.slane %v1827_v15, %v3355_v17  ;;  %v3762_v54 = vsub.s32 %v1095_v48, %v3328_v4  ;;  %v3765_v57 = vsub.s32 %v1102_v50, %v3328_v4  ;;  %v1130_v58 = vadd.s32 4294967248, %v1090_v46  ;;  %v2796_v48 = vld [vmem:[%s3930_s4 + $0x30] sm:$0xff] }
 0x12a   : > { %3086 = vmatpush3.bf16.msra.mxu0 %v3085_v26  ;;  %v3775_v61 = vsub.s32 %v1090_v46, %v3328_v4  ;;  %v3778_v8 = vsub.s32 %v1109_v53, %v3328_v4  ;;  %v3781_v0 = vsub.s32 %v1116_v44, %v3328_v4  ;;  %v3786_v3 = vsub.s32 %v1123_v1, %v3328_v4  ;;  %v352_v31 = vld [vmem:[#allocation2] sm:$0x1] }
 0x12b   : > { %v1842_v21 = vcombine.low %v1834_v20, %v1841_v63  ;;  %3087 = vmatprep.subr.bf16.mxu0 %v3194_v30  ;;  %v1137_v5 = vadd.s32 4294967240, %v1090_v46  ;;  %v3103_v6 = vpack.c.bf16 %v2717_v60, %v2716_v59  ;;  %v3791_v9 = vsub.s32 %v1130_v58, %v3328_v4  ;;  %v2801_v60 = vld [vmem:[%s3930_s4 + $0x58] sm:$0xff] }
 0x12d   : > { %1865 = vperm.xlu1 %3161, %v1842_v21   ;;  %v3800_v19 = vsub.s32 %v1137_v5, %v3328_v4  ;;  %v2802_v5 = vld [vmem:[%s3930_s4 + $0x60] sm:$0xff] }
 0x12e   : > { %3089 = vmatpush3.bf16.msra.mxu0 %v3088_v36  ;;  %v2791_v36 = vld [vmem:[%s3930_s4 + $0x8] sm:$0xff] }
 0x12f   : > { %3090 = vmatprep.subr.bf16.mxu0 %v3194_v30 }
 0x131   : > { %v1067_v62 = vpop.permute.xlu0 %1066 }
 0x132   : > { %3092 = vmatpush3.bf16.msra.mxu0 %v3091_v39  ;;  %v1094_v12 = vrot.slane %v1067_v62, %v3775_v61 }
 0x133   : > { %3093 = vmatprep.subr.bf16.mxu0 %v3194_v30 }
 0x136   : > { %3095 = vmatpush3.bf16.msra.mxu0 %v3094_v43  ;;  %v2794_v43 = vld [vmem:[%s3930_s4 + $0x20] sm:$0xff] }
 0x137   : > { %v3716_v28 = vpop.permute.xlu1 %1069  ;;  %3096 = vmatprep.subr.bf16.mxu0 %v3194_v30  ;;  %v3112_v46 = vpack.c.bf16 %v2795_v45, %v2794_v43 }
 0x138   : > { %v1099_v2 = vrot.slane %v3716_v28, %v3762_v54 }
 0x13a   : > { %3098 = vmatpush3.bf16.msra.mxu0 %v3097_v49  ;;  %v1101_v18 = vsel %vm1100_vm1, %v1099_v2, %v1094_v12  ;;  %v2797_v49 = vld [vmem:[%s3930_s4 + $0x38] sm:$0xff] }
 0x13b   : > { %3099 = vmatprep.subr.bf16.mxu0 %v3194_v30  ;;  %v3115_v53 = vpack.c.bf16 %v2797_v49, %v2796_v48 }
 0x13c   : > { %v3730_v35 = vpop.permute.xlu1 %1072 }
 0x13d   : > { %v1106_v11 = vrot.slane %v3730_v35, %v3765_v57  ;;  %v2790_v35 = vld [vmem:[%s3930_s4] sm:$0xff] }
 0x13e   : > { %3101 = vmatpush3.bf16.msra.mxu0 %v3100_v56  ;;  %v3106_v22 = vpack.c.bf16 %v2791_v36, %v2790_v35  ;;  %v2799_v56 = vld [vmem:[%s3930_s4 + $0x48] sm:$0xff] }
 0x13f   : > { %3102 = vmatprep.subr.bf16.mxu0 %v3194_v30  ;;  %v1108_v15 = vsel %vm1107_vm2, %v1106_v11, %v1101_v18 }
 0x140   : > { %3107 = vmatpush3.bf16.msra.mxu1 %v3106_v22 }
 0x141   : > { %3108 = vmatprep.subr.bf16.mxu1 %v3194_v30 }
 0x142   : > { %v1076_v40 = vpop.permute.xlu1 %1075  ;;  %3104 = vmatpush3.bf16.msra.mxu0 %v3103_v6  ;;  %v2803_v6 = vld [vmem:[%s3930_s4 + $0x68] sm:$0xff] }
 0x143   : > { %v1113_v16 = vrot.slane %v1076_v40, %v3778_v8  ;;  %v2793_v40 = vld [vmem:[%s3930_s4 + $0x18] sm:$0xff]  ;;  %v3124_v12 = vpack.c.bf16 %v2803_v6, %v2802_v5 }
 0x144   : > { %v3109_v42 = vpack.c.bf16 %v2793_v40, %v2792_v37 }
 0x145   : > { %v1115_v63 = vsel %vm1114_vm3, %v1113_v16, %v1108_v15 }
 0x146   : > { %3110 = vmatpush3.bf16.msra.mxu1 %v3109_v42 }
 0x147   : > { %3111 = vmatprep.subr.bf16.mxu1 %v3194_v30 }
 0x148   : > { %v1079_v47 = vpop.permute.xlu1 %1078 }
 0x149   : > { %v1120_v13 = vrot.slane %v1079_v47, %v3781_v0 }
 0x14a   : > { %3113 = vmatpush3.bf16.msra.mxu1 %v3112_v46 }
 0x14b   : > { %v1122_v21 = vsel %vm1121_vm4, %v1120_v13, %v1115_v63  ;;  %3114 = vmatprep.subr.bf16.mxu1 %v3194_v30 }
 0x14d   : > { %v1082_v55 = vpop.permute.xlu1 %1081 }
 0x14e   : > { %v1127_v14 = vrot.slane %v1082_v55, %v3786_v3  ;;  %v2798_v55 = vld [vmem:[%s3930_s4 + $0x40] sm:$0xff]  ;;  %3116 = vmatpush3.bf16.msra.mxu1 %v3115_v53  ;;  %v2805_v53 = vld [vmem:[%s3930_s4 + $0x78] sm:$0xff] }
 0x14f   : > { %v3118_v58 = vpack.c.bf16 %v2799_v56, %v2798_v55  ;;  %3117 = vmatprep.subr.bf16.mxu1 %v3194_v30 }
 0x150   : > { %v1129_v24 = vsel %vm1128_vm5, %v1127_v14, %v1122_v21 }
 0x152   : > { %v1085_v10 = vpop.permute.xlu1 %1084  ;;  %3119 = vmatpush3.bf16.msra.mxu1 %v3118_v58  ;;  %v2806_v58 = vld [vmem:[%s3931_s5] sm:$0x1] }
 0x153   : > { %v1134_v20 = vrot.slane %v1085_v10, %v3791_v9  ;;  %3120 = vmatprep.subr.bf16.mxu1 %v3194_v30 }
 0x155   : > { %v1136_v4 = vsel %vm1135_vm6, %v1134_v20, %v1129_v24 }
 0x158   : > { %v1088_v23 = vpop.permute.xlu1 %1087 }
 0x159   : > { %v1141_v25 = vrot.slane %v1088_v23, %v3800_v19 }
 0x15b   : > { %v1143_v27 = vsel %vm1142_vm7, %v1141_v25, %v1136_v4 }
 0x15c   : > { %v1150_v28 = vrot.slane %v1143_v27, %v3355_v17 }
 0x15d   : > { %v1848_v33 = vpop.permute.xlu0 %1847 }
 0x15e   : > { %v1157_v32 = vrot.slane %v1150_v28, %v3355_v17  ;;  %v1874_v38 = vrot.slane %v1848_v33, %v3762_v54 }
 0x160   : > { %v1159_v26 = vadd.f32 %v1157_v32, %v352_v31 }
 0x162   : > { %1161 = vst.msk [vmem:[#allocation2] sm:$0x1] %vm316_vm0, %v1159_v26  ;;  %v1845_v34 = vpop.permute.xlu1 %1844 }
 0x163   : > { %v1870_v39 = vrot.slane %v1845_v34, %v3775_v61 }
 0x165   : > { %v1875_v41 = vsel %vm1100_vm1, %v1874_v38, %v1870_v39  ;;  %v1923_v39 = vld [vmem:[#allocation4] sm:$0x1] }
 0x167   : > { %v2609_v50 = vpop.permute.xlu0 %2608 }
 0x168   : > { %v2635_v44 = vrot.slane %v2609_v50, %v3762_v54  ;;  %v2800_v54 = vld [vmem:[%s3930_s4 + $0x50] sm:$0xff] }
 0x169   : > { %v2690_v29 = vld [vmem:[#allocation2] sm:$0x1]  ;;  %v3121_v2 = vpack.c.bf16 %v2801_v60, %v2800_v54 }
 0x16a   : > { %v2691_v47 = vmul.f32 0.00390625, %v2690_v29  ;;  %v1162_v29 = vld [vmem:[#allocation3] sm:$0x1] }
 0x16b   : > { %3122 = vmatpush3.bf16.msra.mxu1 %v3121_v2 }
 0x16c   : > { %v2696_v51 = vrot.slane %v2691_v47, %v3331_v7  ;;  %3123 = vmatprep.subr.bf16.mxu1 %v3194_v30 }
 0x16d   : > { %v2606_v52 = vpop.permute.xlu1 %2605 }
 0x16e   : > { %v2631_v1 = vrot.slane %v2606_v52, %v3775_v61  ;;  %2697 = vrot.lane.b32.xlu1 %v2696_v51, %s3196_s16  ;;  %v2804_v52 = vld [vmem:[%s3930_s4 + $0x70] sm:$0xff] }
 0x16f   : > { %3125 = vmatpush3.bf16.msra.mxu1 %v3124_v12 }
 0x170   : > { %v2636_v7 = vsel %vm1100_vm1, %v2635_v44, %v2631_v1  ;;  %3126 = vmatprep.subr.bf16.mxu1 %v3194_v30  ;;  %v3127_v44 = vpack.c.bf16 %v2805_v53, %v2804_v52 }
 0x172   : > { %v2612_v59 = vpop.permute.xlu0 %2611 }
 0x173   : > { %v2640_v61 = vrot.slane %v2612_v59, %v3765_v57  ;;  %3128 = vmatpush3.bf16.msra.mxu1 %v3127_v44 }
 0x175   : > { %v2641_v62 = vsel %vm1107_vm2, %v2640_v61, %v2636_v7 }
 0x177   : > { %v1851_v11 = vpop.permute.xlu1 %1850 }
 0x178   : > { %v1879_v10 = vrot.slane %v1851_v11, %v3765_v57 }
 0x17a   : > { %v1880_v16 = vsel %vm1107_vm2, %v1879_v10, %v1875_v41 }
 0x17c   : > { %v2615_v13 = vpop.permute.xlu0 %2614 }
 0x17d   : > { %v2645_v18 = vrot.slane %v2615_v13, %v3778_v8 }
 0x17f   : > { %v2646_v14 = vsel %vm1114_vm3, %v2645_v18, %v2641_v62 }
 0x182   : > { %v1854_v15 = vpop.permute.xlu1 %1853 }
 0x183   : > { %v1884_v20 = vrot.slane %v1854_v15, %v3778_v8 }
 0x185   : > { %v1885_v63 = vsel %vm1114_vm3, %v1884_v20, %v1880_v16 }
 0x187   : > { %v2618_v57 = vpop.permute.xlu0 %2617 }
 0x188   : > { %v2650_v4 = vrot.slane %v2618_v57, %v3781_v0 }
 0x18a   : > { %v2651_v30 = vsel %vm1121_vm4, %v2650_v4, %v2646_v14 }
 0x18c   : > { %v1857_v21 = vpop.permute.xlu1 %1856 }
 0x18d   : > { %v1889_v33 = vrot.slane %v1857_v21, %v3781_v0 }
 0x18f   : > { %v1890_v22 = vsel %vm1121_vm4, %v1889_v33, %v1885_v63 }
 0x191   : > { %v2621_v23 = vpop.permute.xlu0 %2620 }
 0x192   : > { %v2655_v27 = vrot.slane %v2621_v23, %v3786_v3 }
 0x194   : > { %v2656_v26 = vsel %vm1128_vm5, %v2655_v27, %v2651_v30 }
 0x197   : > { %v1860_v24 = vpop.permute.xlu1 %1859 }
 0x198   : > { %v1894_v35 = vrot.slane %v1860_v24, %v3786_v3 }
 0x19a   : > { %v1895_v42 = vsel %vm1128_vm5, %v1894_v35, %v1890_v22 }
 0x19c   : > { %v2624_v25 = vpop.permute.xlu0 %2623 }
 0x19d   : > { %v2660_v28 = vrot.slane %v2624_v25, %v3791_v9 }
 0x19f   : > { %v2661_v34 = vsel %vm1135_vm6, %v2660_v28, %v2656_v26 }
 0x1a1   : > { %v1863_v31 = vpop.permute.xlu1 %1862 }
 0x1a2   : > { %v1899_v37 = vrot.slane %v1863_v31, %v3791_v9 }
 0x1a4   : > { %v1900_v43 = vsel %vm1135_vm6, %v1899_v37, %v1895_v42 }
 0x1a6   : > { %v2627_v32 = vpop.permute.xlu0 %2626 }
 0x1a7   : > { %v2665_v8 = vrot.slane %v2627_v32, %v3800_v19 }
 0x1a9   : > { %v2666_v36 = vsel %vm1142_vm7, %v2665_v8, %v2661_v34 }
 0x1aa   : > { %v2673_v38 = vrot.slane %v2666_v36, %v3355_v17 }
 0x1ac   : > { %v2680_v40 = vrot.slane %v2673_v38, %v3355_v17  ;;  %v1866_v41 = vpop.permute.xlu1 %1865 }
 0x1ad   : > { %v1904_v0 = vrot.slane %v1866_v41, %v3800_v19 }
 0x1ae   : > { %v2682_v45 = vmax.f32 %v1923_v39, %v2680_v40 }
 0x1af   : > { %v1905_v3 = vsel %vm1142_vm7, %v1904_v0, %v1900_v43 }
 0x1b0   : > { %2683 = vst.msk [vmem:[#allocation4] sm:$0x1] %vm316_vm0, %v2682_v45  ;;  %v1912_v9 = vrot.slane %v1905_v3, %v3355_v17 }
 0x1b2   : > { %v1919_v46 = vrot.slane %v1912_v9, %v3355_v17  ;;  %v2718_v17 = vld [vmem:[%s3929_s3] sm:$0x1] }
 0x1b4   : > { %v1921_v47 = vmax.f32 %v1162_v29, %v1919_v46 }
 0x1b6   : > { %1922 = vst.msk [vmem:[#allocation3] sm:$0x1] %vm316_vm0, %v1921_v47 }
 0x1b7   : > { %v2688_v49 = vld [vmem:[#allocation4] sm:$0x1] }
 0x1bd   : > { %v2687_v48 = vld [vmem:[#allocation3] sm:$0x1] }
 0x1be   : > { %v2689_v50 = vadd.f32 %v2688_v49, %v2687_v48 }
 0x1e0   : > { %v2698_v19 = vpop.permute.xlu1 %2697 }
 0x1e1   : > { %v2701_v51 = vsel %vm2700_vm9, %v2689_v50, %v2698_v19 }
 0x1e2   : > { %3044 = vmatmul.mubr.f32.vlgmr.msra.gmra.mrb[0].mxu0 %v2701_v51 }
 0x2b5   : > { %v2785_v1 = vpop.f32.mrb[0].mxu0 }
 0x2b6   : > { %v2786_v55 = vadd.f32 %v2785_v1, %v2718_v17  ;;  %v3045_v56 = vpop.f32.mrb[1].mxu0 }
 0x2b8   : > { %v2789_v7 = vmax.f32 %v2786_v55, 0.0 }
 0x2ba   : > { %3079 = vmatmul.mubr.f32.vlgmr.msra.gmra.mrb[0].mxu1 %v2789_v7 }
 0x38d   : > { %v2873_v59 = vpop.f32.mrb[0].mxu1 }
 0x38e   : > { %v2874_v54 = vadd.f32 %v2873_v59, %v2806_v58  ;;  %v3080_v60 = vpop.f32.mrb[1].mxu1 }
 0x390   : > { %v2972_v61 = vmul.f32 -1.442695, %v2874_v54 }
 0x392   : > { %3162 = vpow2.f32 %v2972_v61 }
 0x39c   : > { %v3163_v62 = vpop.eup %3162 }
 0x39d   : > { %v2880_v2 = vadd.f32 1.0, %v3163_v62 }
 0x39f   : > { %3164 = vrcp.f32 %v2880_v2 }
 0x3a9   : > { %v3165_v5 = vpop.eup %3164 }
 0x3aa   : > { %2883 = vst [vmem:[%s311_s19] sm:$0x1] %v3165_v5 }
 0x3ab PF: > { %s16_s23 = sadd.s32 1, %s3188_s23   ;;  %s3933_s21 = smov %s3184_s22 }
 0x3ac   : > { %p13_p5 = scmp.ge.s32.totalorder %s16_s23, 4   ;;  %s3934_s22 = smov %s3936_s24 }
 0x3ae   :  { %15 = sbr.rel (!%p13_p5) target bundleno = 2 (0x2), region = 85 }

</bundles_post_ra>
